<compile_context>
chip_gen: v7x
topology: tpu7x:2x2x1
jax: 0.10.0
libtpu: 0.0.40
codegen_flags: <defaults>
</compile_context>

<pallas_src>
import functools

import jax
import jax.numpy as jnp
from jax.experimental import pallas as pl
from jax.experimental.pallas import tpu as pltpu

NUM_LAYERS = 3


def _bpr_kernel(aui_ref, aiu_ref, di_ref, dj_ref, u0_hbm_ref, i0_hbm_ref,
                out_u_ref, out_i_ref,
                u_f32, i_f32, u_bf, i_bf, u_acc, i_acc, sem):
    l = pl.program_id(0)                     # GCN layer (outer, sequential)
    r = pl.program_id(1)                     # row tile
    k = pl.program_id(2)                     # contraction (K) tile (inner)
    n_k = pl.num_programs(2)

    tm, tk = aui_ref.shape                   # static block sizes
    row0 = pl.multiple_of(r * tm, tm)
    col0 = pl.multiple_of(k * tk, tk)

    # One-time seed of the resident f32 embedding state from HBM.
    @pl.when(jnp.logical_and(l == 0, jnp.logical_and(r == 0, k == 0)))
    def _seed():
        cu = pltpu.make_async_copy(u0_hbm_ref, u_f32, sem.at[0])
        ci = pltpu.make_async_copy(i0_hbm_ref, i_f32, sem.at[1])
        cu.start()
        ci.start()
        cu.wait()
        ci.wait()

    # Once per layer: snapshot the previous-layer embeddings to bf16 (MXU RHS).
    @pl.when(jnp.logical_and(r == 0, k == 0))
    def _snapshot():
        u_bf[...] = u_f32[...].astype(jnp.bfloat16)
        i_bf[...] = i_f32[...].astype(jnp.bfloat16)

    # Initialize the f32 accumulators with the self-loop / residual term
    # (read the *previous* layer's f32 rows before they are overwritten below).
    @pl.when(k == 0)
    def _init_acc():
        u_acc[...] = u_f32[pl.ds(row0, tm), :] * di_ref[...]
        i_acc[...] = i_f32[pl.ds(row0, tm), :] * dj_ref[...]

    # MXU partial products for this K tile (bf16 x bf16 -> f32 accumulate).
    u_acc[...] += jnp.dot(aui_ref[...], i_bf[pl.ds(col0, tk), :],
                          preferred_element_type=jnp.float32)
    i_acc[...] += jnp.dot(aiu_ref[...], u_bf[pl.ds(col0, tk), :],
                          preferred_element_type=jnp.float32)

    # Finalize: ReLU, update the resident state in place, emit this layer's slab.
    @pl.when(k == n_k - 1)
    def _finalize():
        u_new = jnp.maximum(u_acc[...], 0.0)
        i_new = jnp.maximum(i_acc[...], 0.0)
        u_f32[pl.ds(row0, tm), :] = u_new
        i_f32[pl.ds(row0, tm), :] = i_new
        out_u_ref[...] = u_new
        out_i_ref[...] = i_new


def bpr_forward(user_item_matrix, item_user_matrix,
                users_embedding, items_embedding,
                d_i_train, d_j_train, *, tm=128, tk=128):
    """Fused BPR/GCN forward. Returns (gcn_users_embedding, gcn_items_embedding)."""
    U, I = user_item_matrix.shape
    F = users_embedding.shape[1]
    relu = lambda x: jnp.maximum(x, 0.0)

    # Pad users and items to one common size n_p, a multiple of both tm and tk
    # (zero rows/cols of A, zero embeddings and zero degrees stay exactly zero).
    tile = max(tm, tk) if max(tm, tk) % min(tm, tk) == 0 else tm * tk
    n_p = pl.cdiv(max(U, I), tile) * tile
    nt = n_p // tm
    kt = n_p // tk

    def pad_rows(x, rows):
        return jnp.pad(x, ((0, rows - x.shape[0]),) + ((0, 0),) * (x.ndim - 1))

    # bf16 adjacency: halves HBM bytes on the dominant operand; f32 accumulation.
    a_ui = jnp.pad(user_item_matrix.astype(jnp.float32),
                   ((0, n_p - U), (0, n_p - I))).astype(jnp.bfloat16)
    a_iu = jnp.pad(item_user_matrix.astype(jnp.float32),
                   ((0, n_p - I), (0, n_p - U))).astype(jnp.bfloat16)
    u0 = pad_rows(users_embedding.astype(jnp.float32), n_p)
    i0 = pad_rows(items_embedding.astype(jnp.float32), n_p)
    d_i = pad_rows(jnp.asarray(d_i_train, jnp.float32).reshape(U, 1), n_p)
    d_j = pad_rows(jnp.asarray(d_j_train, jnp.float32).reshape(I, 1), n_p)

    out_shapes = (
        jax.ShapeDtypeStruct((n_p, NUM_LAYERS * F), jnp.float32),
        jax.ShapeDtypeStruct((n_p, NUM_LAYERS * F), jnp.float32),
    )

    in_specs = [
        pl.BlockSpec((tm, tk), lambda l, r, k: (r, k)),   # A_ui (tm, tk) tile
        pl.BlockSpec((tm, tk), lambda l, r, k: (r, k)),   # A_iu (tm, tk) tile
        pl.BlockSpec((tm, 1), lambda l, r, k: (r, 0)),    # user degrees (re-fetched per row tile only)
        pl.BlockSpec((tm, 1), lambda l, r, k: (r, 0)),    # item degrees
        pl.BlockSpec(memory_space=pl.ANY),                # u0 (HBM; one-shot DMA into scratch)
        pl.BlockSpec(memory_space=pl.ANY),                # i0
    ]
    # Each (row tile, layer) slab of the output is written exactly once.
    out_specs = (
        pl.BlockSpec((tm, F), lambda l, r, k: (r, l)),
        pl.BlockSpec((tm, F), lambda l, r, k: (r, l)),
    )
    scratch_shapes = [
        pltpu.VMEM((n_p, F), jnp.float32),    # resident user state (updated in place)
        pltpu.VMEM((n_p, F), jnp.float32),    # resident item state
        pltpu.VMEM((n_p, F), jnp.bfloat16),   # per-layer bf16 snapshot (user, MXU RHS)
        pltpu.VMEM((n_p, F), jnp.bfloat16),   # per-layer bf16 snapshot (item)
        pltpu.VMEM((tm, F), jnp.float32),     # user accumulator
        pltpu.VMEM((tm, F), jnp.float32),     # item accumulator
        pltpu.SemaphoreType.DMA((2,)),        # seed copies
    ]

    # Generation-aware VMEM budget: 3/4 of physical, capped at 96 MiB.
    # Fallback assumes 64 MiB physical (safe on every generation; the resident
    # footprint here is ~12 bytes/node/factor so 48 MiB is ample).
    try:
        vmem_cap = pltpu.get_tpu_info().vmem_capacity_bytes
    except Exception:
        vmem_cap = 64 << 20
    vmem_limit = int(min((vmem_cap * 3) // 4, 96 << 20))

    flops = NUM_LAYERS * 2 * 2 * n_p * n_p * F
    bytes_accessed = (NUM_LAYERS * 2 * n_p * n_p * 2      # bf16 A, streamed once per layer
                      + 2 * n_p * F * 4                    # u0 / i0 seed DMA
                      + 2 * n_p * NUM_LAYERS * F * 4       # layer slabs, written once each
                      + NUM_LAYERS * 2 * n_p * 4)          # degree columns
    cost = pl.CostEstimate(flops=flops, transcendentals=0,
                           bytes_accessed=int(bytes_accessed))

    out_u, out_i = pl.pallas_call(
        _bpr_kernel,
        out_shape=out_shapes,
        grid_spec=pltpu.PrefetchScalarGridSpec(
            num_scalar_prefetch=0,
            grid=(NUM_LAYERS, nt, kt),
            in_specs=in_specs,
            out_specs=out_specs,
            scratch_shapes=scratch_shapes,
        ),
        compiler_params=pltpu.CompilerParams(
            # All axes sequential: layers carry the resident state, row tiles
            # update shared scratch consumed by the next layer, K carries the
            # accumulator.
            dimension_semantics=("arbitrary", "arbitrary", "arbitrary"),
            vmem_limit_bytes=vmem_limit,
        ),
        cost_estimate=cost,
    )(a_ui, a_iu, d_i, d_j, u0, i0)

    # Layer-0 slab (relu of the raw embeddings) is a trivial elementwise op;
    # assemble the 4F-wide concatenation here.  Layers 1..3 are already >= 0.
    gcn_users = jnp.concatenate(
        [relu(users_embedding.astype(jnp.float32)), out_u[:U]], axis=-1)
    gcn_items = jnp.concatenate(
        [relu(items_embedding.astype(jnp.float32)), out_i[:I]], axis=-1)
    return gcn_users, gcn_items


def reference_forward(A_ui, A_iu, u0, i0, d_i_vec, d_j_vec):
    """Pure-JAX reference with the PyTorch forward semantics (bf16 matmul inputs
    matching the kernel; residuals and intermediates in f32)."""
    relu = lambda x: jnp.maximum(x, 0.0)
    d_i = jnp.asarray(d_i_vec, jnp.float32).reshape(-1, 1)
    d_j = jnp.asarray(d_j_vec, jnp.float32).reshape(-1, 1)
    a_ui = A_ui.astype(jnp.bfloat16)
    a_iu = A_iu.astype(jnp.bfloat16)
    mm = lambda a, b: jnp.dot(a, b.astype(jnp.bfloat16),
                              preferred_element_type=jnp.float32)
    u1 = relu(mm(a_ui, i0) + u0 * d_i)
    i1 = relu(mm(a_iu, u0) + i0 * d_j)
    u2 = relu(mm(a_ui, i1) + u1 * d_i)
    i2 = relu(mm(a_iu, u1) + i1 * d_j)
    u3 = relu(mm(a_ui, i2) + u2 * d_i)
    i3 = relu(mm(a_iu, u2) + i2 * d_j)
    gu = relu(jnp.concatenate([u0, u1, u2, u3], axis=-1))
    gi = relu(jnp.concatenate([i0, i1, i2, i3], axis=-1))
    return gu, gi


if __name__ == "__main__":
    # Small deterministic synthetic problem (F multiple of 128 keeps output
    # slabs lane-dense; U/I deliberately not multiples of the tile size to
    # exercise the padding path).
    user_num, item_num, factor_num = 200, 328, 128

    key = jax.random.PRNGKey(0)
    k1, k2, k3 = jax.random.split(key, 3)

    users_embedding = jax.random.normal(k1, (user_num, factor_num), jnp.float32) * 0.1
    items_embedding = jax.random.normal(k2, (item_num, factor_num), jnp.float32) * 0.1

    # Dense stand-ins for the (normalized) sparse adjacency matrices.
    mask_ui = (jax.random.uniform(k3, (user_num, item_num)) < 0.1).astype(jnp.float32)
    A_ui = mask_ui / (mask_ui.sum(axis=1, keepdims=True) + 1.0)
    A_iu = mask_ui.T / (mask_ui.T.sum(axis=1, keepdims=True) + 1.0)

    # Degree-based self-loop weights d_i_train / d_j_train (one scalar per node).
    d_i_train = 1.0 / (mask_ui.sum(axis=1) + 1.0)
    d_j_train = 1.0 / (mask_ui.sum(axis=0) + 1.0)

    gcn_users, gcn_items = bpr_forward(A_ui, A_iu,
                                       users_embedding, items_embedding,
                                       d_i_train, d_j_train, tm=128, tk=128)
    jax.block_until_ready((gcn_users, gcn_items))

    ref_u, ref_i = reference_forward(A_ui, A_iu, users_embedding, items_embedding,
                                     d_i_train, d_j_train)
    assert gcn_users.shape == (user_num, 4 * factor_num)
    assert gcn_items.shape == (item_num, 4 * factor_num)
    assert jnp.allclose(gcn_users, ref_u, atol=2e-3, rtol=2e-3)
    assert jnp.allclose(gcn_items, ref_i, atol=2e-3, rtol=2e-3)

    print("KERNEL_OK")
</pallas_src>

<mosaic_0001>
module attributes {stable_mosaic.version = 11 : i64} {
  func.func @_bpr_kernel(%arg0: i32, %arg1: i32, %arg2: i32, %arg3: memref<128x128xbf16, #tpu.memory_space<vmem>>, %arg4: memref<128x128xbf16, #tpu.memory_space<vmem>>, %arg5: memref<128x1xf32, #tpu.memory_space<vmem>>, %arg6: memref<128x1xf32, #tpu.memory_space<vmem>>, %arg7: memref<384x128xf32, #tpu.memory_space<any>>, %arg8: memref<384x128xf32, #tpu.memory_space<any>>, %arg9: memref<128x128xf32, #tpu.memory_space<vmem>>, %arg10: memref<128x128xf32, #tpu.memory_space<vmem>>, %arg11: memref<384x128xf32, #tpu.memory_space<vmem>>, %arg12: memref<384x128xf32, #tpu.memory_space<vmem>>, %arg13: memref<384x128xbf16, #tpu.memory_space<vmem>>, %arg14: memref<384x128xbf16, #tpu.memory_space<vmem>>, %arg15: memref<128x128xf32, #tpu.memory_space<vmem>>, %arg16: memref<128x128xf32, #tpu.memory_space<vmem>>, %arg17: memref<2x!tpu.dma_semaphore, #tpu.memory_space<semaphore_mem>>) attributes {dimension_semantics = [#tpu.dimension_semantics<arbitrary>, #tpu.dimension_semantics<arbitrary>, #tpu.dimension_semantics<arbitrary>], iteration_bounds = array<i64: 3, 3, 3>, scalar_prefetch = 0 : i64, scratch_operands = 7 : i64, tpu.core_type = #tpu.core_type<tc>, window_params = [{transform_indices = @transform_0, window_bounds = array<i64: 128, 128>}, {transform_indices = @transform_1, window_bounds = array<i64: 128, 128>}, {transform_indices = @transform_2, window_bounds = array<i64: 128, 1>}, {transform_indices = @transform_3, window_bounds = array<i64: 128, 1>}, {}, {}, {transform_indices = @transform_6, window_bounds = array<i64: 128, 128>}, {transform_indices = @transform_7, window_bounds = array<i64: 128, 128>}]} {
    %c128_i32 = arith.constant 128 : i32
    %0 = arith.muli %arg1, %c128_i32 : i32
    %1 = tpu.assume_multiple %0, 128 : i32
    %c128_i32_0 = arith.constant 128 : i32
    %2 = arith.muli %arg2, %c128_i32_0 : i32
    %3 = tpu.assume_multiple %2, 128 : i32
    %c0_i32 = arith.constant 0 : i32
    %4 = arith.cmpi eq, %arg0, %c0_i32 : i32
    %c0_i32_1 = arith.constant 0 : i32
    %5 = arith.cmpi eq, %arg1, %c0_i32_1 : i32
    %c0_i32_2 = arith.constant 0 : i32
    %6 = arith.cmpi eq, %arg2, %c0_i32_2 : i32
    %7 = arith.andi %5, %6 : i1
    %8 = arith.andi %4, %7 : i1
    %9 = arith.extui %8 : i1 to i32
    %c0_i32_3 = arith.constant 0 : i32
    %10 = arith.cmpi ne, %9, %c0_i32_3 : i32
    scf.if %10 {
      %c0_i32_24 = arith.constant 0 : i32
      %36 = tpu.memref_slice %arg17[%c0_i32_24] : memref<2x!tpu.dma_semaphore, #tpu.memory_space<semaphore_mem>> -> memref<1x!tpu.dma_semaphore, #tpu.memory_space<semaphore_mem>>
      %37 = tpu.memref_squeeze %36 : memref<1x!tpu.dma_semaphore, #tpu.memory_space<semaphore_mem>> -> memref<!tpu.dma_semaphore, #tpu.memory_space<semaphore_mem>>
      tpu.enqueue_dma source(%arg7 : memref<384x128xf32, #tpu.memory_space<any>>) target(%arg11 : memref<384x128xf32, #tpu.memory_space<vmem>>) target_semaphore(%37 : memref<!tpu.dma_semaphore, #tpu.memory_space<semaphore_mem>>)
      %c1_i32 = arith.constant 1 : i32
      %38 = tpu.memref_slice %arg17[%c1_i32] : memref<2x!tpu.dma_semaphore, #tpu.memory_space<semaphore_mem>> -> memref<1x!tpu.dma_semaphore, #tpu.memory_space<semaphore_mem>>
      %39 = tpu.memref_squeeze %38 : memref<1x!tpu.dma_semaphore, #tpu.memory_space<semaphore_mem>> -> memref<!tpu.dma_semaphore, #tpu.memory_space<semaphore_mem>>
      tpu.enqueue_dma source(%arg8 : memref<384x128xf32, #tpu.memory_space<any>>) target(%arg12 : memref<384x128xf32, #tpu.memory_space<vmem>>) target_semaphore(%39 : memref<!tpu.dma_semaphore, #tpu.memory_space<semaphore_mem>>)
      %c0_i32_25 = arith.constant 0 : i32
      %40 = tpu.memref_slice %arg17[%c0_i32_25] : memref<2x!tpu.dma_semaphore, #tpu.memory_space<semaphore_mem>> -> memref<1x!tpu.dma_semaphore, #tpu.memory_space<semaphore_mem>>
      %41 = tpu.memref_squeeze %40 : memref<1x!tpu.dma_semaphore, #tpu.memory_space<semaphore_mem>> -> memref<!tpu.dma_semaphore, #tpu.memory_space<semaphore_mem>>
      tpu.wait_dma2 semaphore(%41 : memref<!tpu.dma_semaphore, #tpu.memory_space<semaphore_mem>>) src(%arg7 : memref<384x128xf32, #tpu.memory_space<any>>) dst(%arg11 : memref<384x128xf32, #tpu.memory_space<vmem>>)
      %c1_i32_26 = arith.constant 1 : i32
      %42 = tpu.memref_slice %arg17[%c1_i32_26] : memref<2x!tpu.dma_semaphore, #tpu.memory_space<semaphore_mem>> -> memref<1x!tpu.dma_semaphore, #tpu.memory_space<semaphore_mem>>
      %43 = tpu.memref_squeeze %42 : memref<1x!tpu.dma_semaphore, #tpu.memory_space<semaphore_mem>> -> memref<!tpu.dma_semaphore, #tpu.memory_space<semaphore_mem>>
      tpu.wait_dma2 semaphore(%43 : memref<!tpu.dma_semaphore, #tpu.memory_space<semaphore_mem>>) src(%arg8 : memref<384x128xf32, #tpu.memory_space<any>>) dst(%arg12 : memref<384x128xf32, #tpu.memory_space<vmem>>)
    } else {
    }
    %c0_i32_4 = arith.constant 0 : i32
    %11 = arith.cmpi eq, %arg1, %c0_i32_4 : i32
    %c0_i32_5 = arith.constant 0 : i32
    %12 = arith.cmpi eq, %arg2, %c0_i32_5 : i32
    %13 = arith.andi %11, %12 : i1
    %14 = arith.extui %13 : i1 to i32
    %c0_i32_6 = arith.constant 0 : i32
    %15 = arith.cmpi ne, %14, %c0_i32_6 : i32
    scf.if %15 {
      %c0_24 = arith.constant 0 : index
      %c0_25 = arith.constant 0 : index
      %36 = vector.load %arg11[%c0_24, %c0_25] : memref<384x128xf32, #tpu.memory_space<vmem>>, vector<384x128xf32>
      %37 = arith.truncf %36 : vector<384x128xf32> to vector<384x128xbf16>
      %c0_26 = arith.constant 0 : index
      %c0_27 = arith.constant 0 : index
      %38 = vector.load %arg13[%c0_26, %c0_27] : memref<384x128xbf16, #tpu.memory_space<vmem>>, vector<384x128xbf16>
      tpu.vector_store %arg13[%c0_26, %c0_27], %37 {strides = array<i32>} : memref<384x128xbf16, #tpu.memory_space<vmem>>, vector<384x128xbf16>,
      %c0_28 = arith.constant 0 : index
      %c0_29 = arith.constant 0 : index
      %39 = vector.load %arg12[%c0_28, %c0_29] : memref<384x128xf32, #tpu.memory_space<vmem>>, vector<384x128xf32>
      %40 = arith.truncf %39 : vector<384x128xf32> to vector<384x128xbf16>
      %c0_30 = arith.constant 0 : index
      %c0_31 = arith.constant 0 : index
      %41 = vector.load %arg14[%c0_30, %c0_31] : memref<384x128xbf16, #tpu.memory_space<vmem>>, vector<384x128xbf16>
      tpu.vector_store %arg14[%c0_30, %c0_31], %40 {strides = array<i32>} : memref<384x128xbf16, #tpu.memory_space<vmem>>, vector<384x128xbf16>,
    } else {
    }
    %c0_i32_7 = arith.constant 0 : i32
    %16 = arith.cmpi eq, %arg2, %c0_i32_7 : i32
    %17 = arith.extui %16 : i1 to i32
    %c0_i32_8 = arith.constant 0 : i32
    %18 = arith.cmpi ne, %17, %c0_i32_8 : i32
    scf.if %18 {
      %36 = arith.index_cast %1 : i32 to index
      %c0_24 = arith.constant 0 : index
      %37 = vector.load %arg11[%36, %c0_24] : memref<384x128xf32, #tpu.memory_space<vmem>>, vector<128x128xf32>
      %c0_25 = arith.constant 0 : index
      %c0_26 = arith.constant 0 : index
      %38 = vector.load %arg5[%c0_25, %c0_26] : memref<128x1xf32, #tpu.memory_space<vmem>>, vector<128x1xf32>
      %39 = vector.broadcast %38 : vector<128x1xf32> to vector<128x128xf32>
      %40 = arith.mulf %37, %39 : vector<128x128xf32>
      %c0_27 = arith.constant 0 : index
      %c0_28 = arith.constant 0 : index
      %41 = vector.load %arg15[%c0_27, %c0_28] : memref<128x128xf32, #tpu.memory_space<vmem>>, vector<128x128xf32>
      tpu.vector_store %arg15[%c0_27, %c0_28], %40 {strides = array<i32>} : memref<128x128xf32, #tpu.memory_space<vmem>>, vector<128x128xf32>,
      %42 = arith.index_cast %1 : i32 to index
      %c0_29 = arith.constant 0 : index
      %43 = vector.load %arg12[%42, %c0_29] : memref<384x128xf32, #tpu.memory_space<vmem>>, vector<128x128xf32>
      %c0_30 = arith.constant 0 : index
      %c0_31 = arith.constant 0 : index
      %44 = vector.load %arg6[%c0_30, %c0_31] : memref<128x1xf32, #tpu.memory_space<vmem>>, vector<128x1xf32>
      %45 = vector.broadcast %44 : vector<128x1xf32> to vector<128x128xf32>
      %46 = arith.mulf %43, %45 : vector<128x128xf32>
      %c0_32 = arith.constant 0 : index
      %c0_33 = arith.constant 0 : index
      %47 = vector.load %arg16[%c0_32, %c0_33] : memref<128x128xf32, #tpu.memory_space<vmem>>, vector<128x128xf32>
      tpu.vector_store %arg16[%c0_32, %c0_33], %46 {strides = array<i32>} : memref<128x128xf32, #tpu.memory_space<vmem>>, vector<128x128xf32>,
    } else {
    }
    %c0 = arith.constant 0 : index
    %c0_9 = arith.constant 0 : index
    %19 = vector.load %arg15[%c0, %c0_9] : memref<128x128xf32, #tpu.memory_space<vmem>>, vector<128x128xf32>
    %c0_10 = arith.constant 0 : index
    %c0_11 = arith.constant 0 : index
    %20 = vector.load %arg3[%c0_10, %c0_11] : memref<128x128xbf16, #tpu.memory_space<vmem>>, vector<128x128xbf16>
    %21 = arith.index_cast %3 : i32 to index
    %c0_12 = arith.constant 0 : index
    %22 = vector.load %arg14[%21, %c0_12] : memref<384x128xbf16, #tpu.memory_space<vmem>>, vector<128x128xbf16>
    %cst = arith.constant dense<0.000000e+00> : vector<128x128xf32>
    %23 = tpu.matmul %20, %22, %cst {dimension_numbers = #tpu.dot_dimension_numbers<[1], [0], [0], [1], [0, 0, 1, 1], [], []>} : vector<128x128xbf16>, vector<128x128xbf16>, vector<128x128xf32> -> vector<128x128xf32>
    %24 = arith.addf %19, %23 : vector<128x128xf32>
    %c0_13 = arith.constant 0 : index
    %c0_14 = arith.constant 0 : index
    %25 = vector.load %arg15[%c0_13, %c0_14] : memref<128x128xf32, #tpu.memory_space<vmem>>, vector<128x128xf32>
    tpu.vector_store %arg15[%c0_13, %c0_14], %24 {strides = array<i32>} : memref<128x128xf32, #tpu.memory_space<vmem>>, vector<128x128xf32>,
    %c0_15 = arith.constant 0 : index
    %c0_16 = arith.constant 0 : index
    %26 = vector.load %arg16[%c0_15, %c0_16] : memref<128x128xf32, #tpu.memory_space<vmem>>, vector<128x128xf32>
    %c0_17 = arith.constant 0 : index
    %c0_18 = arith.constant 0 : index
    %27 = vector.load %arg4[%c0_17, %c0_18] : memref<128x128xbf16, #tpu.memory_space<vmem>>, vector<128x128xbf16>
    %28 = arith.index_cast %3 : i32 to index
    %c0_19 = arith.constant 0 : index
    %29 = vector.load %arg13[%28, %c0_19] : memref<384x128xbf16, #tpu.memory_space<vmem>>, vector<128x128xbf16>
    %cst_20 = arith.constant dense<0.000000e+00> : vector<128x128xf32>
    %30 = tpu.matmul %27, %29, %cst_20 {dimension_numbers = #tpu.dot_dimension_numbers<[1], [0], [0], [1], [0, 0, 1, 1], [], []>} : vector<128x128xbf16>, vector<128x128xbf16>, vector<128x128xf32> -> vector<128x128xf32>
    %31 = arith.addf %26, %30 : vector<128x128xf32>
    %c0_21 = arith.constant 0 : index
    %c0_22 = arith.constant 0 : index
    %32 = vector.load %arg16[%c0_21, %c0_22] : memref<128x128xf32, #tpu.memory_space<vmem>>, vector<128x128xf32>
    tpu.vector_store %arg16[%c0_21, %c0_22], %31 {strides = array<i32>} : memref<128x128xf32, #tpu.memory_space<vmem>>, vector<128x128xf32>,
    %c2_i32 = arith.constant 2 : i32
    %33 = arith.cmpi eq, %arg2, %c2_i32 : i32
    %34 = arith.extui %33 : i1 to i32
    %c0_i32_23 = arith.constant 0 : i32
    %35 = arith.cmpi ne, %34, %c0_i32_23 : i32
    scf.if %35 {
      %c0_24 = arith.constant 0 : index
      %c0_25 = arith.constant 0 : index
      %36 = vector.load %arg15[%c0_24, %c0_25] : memref<128x128xf32, #tpu.memory_space<vmem>>, vector<128x128xf32>
      %cst_26 = arith.constant 0.000000e+00 : f32
      %37 = vector.broadcast %cst_26 : f32 to vector<128x128xf32>
      %38 = arith.maximumf %36, %37 : vector<128x128xf32>
      %c0_27 = arith.constant 0 : index
      %c0_28 = arith.constant 0 : index
      %39 = vector.load %arg16[%c0_27, %c0_28] : memref<128x128xf32, #tpu.memory_space<vmem>>, vector<128x128xf32>
      %cst_29 = arith.constant 0.000000e+00 : f32
      %40 = vector.broadcast %cst_29 : f32 to vector<128x128xf32>
      %41 = arith.maximumf %39, %40 : vector<128x128xf32>
      %42 = arith.index_cast %1 : i32 to index
      %c0_30 = arith.constant 0 : index
      %43 = vector.load %arg11[%42, %c0_30] : memref<384x128xf32, #tpu.memory_space<vmem>>, vector<128x128xf32>
      tpu.vector_store %arg11[%42, %c0_30], %38 {strides = array<i32>} : memref<384x128xf32, #tpu.memory_space<vmem>>, vector<128x128xf32>,
      %44 = arith.index_cast %1 : i32 to index
      %c0_31 = arith.constant 0 : index
      %45 = vector.load %arg12[%44, %c0_31] : memref<384x128xf32, #tpu.memory_space<vmem>>, vector<128x128xf32>
      tpu.vector_store %arg12[%44, %c0_31], %41 {strides = array<i32>} : memref<384x128xf32, #tpu.memory_space<vmem>>, vector<128x128xf32>,
      %c0_32 = arith.constant 0 : index
      %c0_33 = arith.constant 0 : index
      %46 = vector.load %arg9[%c0_32, %c0_33] : memref<128x128xf32, #tpu.memory_space<vmem>>, vector<128x128xf32>
      tpu.vector_store %arg9[%c0_32, %c0_33], %38 {strides = array<i32>} : memref<128x128xf32, #tpu.memory_space<vmem>>, vector<128x128xf32>,
      %c0_34 = arith.constant 0 : index
      %c0_35 = arith.constant 0 : index
      %47 = vector.load %arg10[%c0_34, %c0_35] : memref<128x128xf32, #tpu.memory_space<vmem>>, vector<128x128xf32>
      tpu.vector_store %arg10[%c0_34, %c0_35], %41 {strides = array<i32>} : memref<128x128xf32, #tpu.memory_space<vmem>>, vector<128x128xf32>,
    } else {
    }
    return
  }
  func.func @transform_0(%arg0: i32, %arg1: i32, %arg2: i32) -> (i32, i32) {
    %c0_i32 = arith.constant 0 : i32
    return %arg1, %arg2 : i32, i32
  }
  func.func @transform_1(%arg0: i32, %arg1: i32, %arg2: i32) -> (i32, i32) {
    %c0_i32 = arith.constant 0 : i32
    return %arg1, %arg2 : i32, i32
  }
  func.func @transform_2(%arg0: i32, %arg1: i32, %arg2: i32) -> (i32, i32) {
    %c0_i32 = arith.constant 0 : i32
    %c0_i32_0 = arith.constant 0 : i32
    return %arg1, %c0_i32 : i32, i32
  }
  func.func @transform_3(%arg0: i32, %arg1: i32, %arg2: i32) -> (i32, i32) {
    %c0_i32 = arith.constant 0 : i32
    %c0_i32_0 = arith.constant 0 : i32
    return %arg1, %c0_i32 : i32, i32
  }
  func.func @transform_6(%arg0: i32, %arg1: i32, %arg2: i32) -> (i32, i32) {
    %c0_i32 = arith.constant 0 : i32
    return %arg1, %arg0 : i32, i32
  }
  func.func @transform_7(%arg0: i32, %arg1: i32, %arg2: i32) -> (i32, i32) {
    %c0_i32 = arith.constant 0 : i32
    return %arg1, %arg0 : i32, i32
  }
}

</mosaic_0001>

<bundles_post_ra>
// kernel: tpu_custom_call.1
= control target key start
LH: loop header
LB: loop body
LE: loop exit
PB: predicated region body
PF: predicated region fallthrough
CT: control target
= control target key end

     0   :  { %s3017_s0 = inlined_call_operand.vmem [shape: bf16[384,384], index: 0, kind: input, shape index: {}]   ;;  %s3018_s1 = inlined_call_operand.hbm [shape: bf16[384,384], index: 1, kind: input, shape index: {}]   ;;  %s3019_s2 = inlined_call_operand.vmem [shape: f32[384,1], index: 2, kind: input, shape index: {}]   ;;  %s3020_s3 = inlined_call_operand.vmem [shape: f32[384,1], index: 3, kind: input, shape index: {}]   ;;  %s3021_s4 = inlined_call_operand.hbm [shape: f32[384,128], index: 4, kind: input, shape index: {}]   ;;  %s3022_s5 = inlined_call_operand.hbm [shape: f32[384,128], index: 5, kind: input, shape index: {}]   ;;  %s3023_s6 = inlined_call_operand.hbm [shape: f32[384,384], index: 6, kind: output, shape index: {0}]   ;;  %s3024_s7 = inlined_call_operand.hbm [shape: f32[384,384], index: 7, kind: output, shape index: {1}]  }
   0x1   :  { %3038 = sst [smem:[#allocation36_spill]] %s3017_s0 }
   0x2   :  { %3039 = sst [smem:[#allocation37_spill]] %s3018_s1 }
   0x3   :  { %3040 = sst [smem:[#allocation38_spill]] %s3019_s2 }
   0x4   :  { %3041 = sst [smem:[#allocation39_spill]] %s3020_s3 }
   0x5   :  { %3042 = sst [smem:[#allocation40_spill]] %s3022_s5 }
   0x6   :  { %3043 = sst [smem:[#allocation41_spill]] %s3023_s6 }
   0x7   :  { %3044 = sst [smem:[#allocation42_spill]] %s3024_s7 }
   0x8   :  { %13 = vsyncpa [#allocation11], 0 }
   0x9   :  { %15 = vsyncpa [#allocation11 + $0x1], 0 }
   0xa   :  { %16 = vsyncpa [#allocation12], 0 }
   0xb   :  { %18 = vsyncpa [#allocation12 + $0x1], 0 }
   0xc   :  { %19 = vsyncpa [#allocation15], 0 }
   0xd   :  { %21 = vsyncpa [#allocation15 + $0x1], 0  ;;  %s2415_s24 = smov 0   ;;  %s2417_s25 = smov 0  }
   0xe   :  { %s2419_s26 = smov 0   ;;  %s2421_s27 = smov 0  }
   0xf   :  { %s2423_s28 = smov 0   ;;  %s2425_s29 = smov 0  }
  0x10   :  { %s2427_s30 = smov 0   ;;  %s2429_s8 = smov 0  }
  0x11   :  { %s2431_s9 = smov 0   ;;  %s2433_s10 = smov 0  }
  0x12   :  { %s2435_s11 = smov 0   ;;  %s2437_s12 = smov 0  }
  0x13   :  { %s2439_s13 = smov 0  }
  0x14 LB: > { %3045 = sst [smem:[#allocation27_spill]] %s2333_s29  ;;  %s3025_s14 = sadd.s32 4294967295, %s2361_s13   ;;  %s2361_s13 = sphi %s2439_s13, %s27_s13   ;;  %s2357_s12 = sphi %s2437_s12, %s3085_s12   ;;  %s2353_s11 = sphi %s2435_s11, %s3084_s11   ;;  %s2349_s10 = sphi %s2433_s10, %s3083_s10   ;;  %s2345_s9 = sphi %s2431_s9, %s3082_s9   ;;  %s2341_s8 = sphi %s2429_s8, %s3081_s8   ;;  %s2337_s30 = sphi %s2427_s30, %s3080_s30   ;;  %s2333_s29 = sphi %s2425_s29, %s3079_s29   ;;  %s2329_s28 = sphi %s2423_s28, %s3090_s28   ;;  %s2325_s27 = sphi %s2421_s27, %s3089_s27   ;;  %s2321_s26 = sphi %s2419_s26, %s3088_s26   ;;  %s2317_s25 = sphi %s2417_s25, %s3087_s25   ;;  %s2313_s24 = sphi %s2415_s24, %s3086_s24  }
  0x15   : > { %3046 = sst [smem:[#allocation28_spill]] %s2349_s10  ;;  %s39_s16 = sadd.s32 1, %s2349_s10 }
  0x16   : > { %3047 = sst [smem:[#allocation29_spill]] %s2353_s11  ;;  %s42_s17 = sadd.s32 1, %s2353_s11 }
  0x17   : > { %3048 = sst [smem:[#allocation30_spill]] %s2357_s12  ;;  %p40_p0 = scmp.ge.s32.totalorder %s39_s16, 3 }
  0x18   : > { %s46_s18 = sadd.s32 1, %s2357_s12  ;;  %s55_s19 = sadd.s32 1, %s2333_s29 }
  0x19   : > { %p62_p1 = scmp.ne.s32.totalorder %s2333_s29, %s2329_s28  ;;  %s3092_s16 = smov (%p40_p0, %s39_s16), 0 }
  0x1a   : > { %3049 = sst [smem:[#allocation31_spill]] %s3092_s16  ;;  %s3094_s17 = smov (!%p40_p0, %s42_s17), %s2353_s11 }
  0x1b   : > { %s51_s20 = ssub.s32 %s2349_s10, %s3092_s16  ;;  %p63_p2 = scmp.eq.s32.totalorder %s2361_s13, 0 }
  0x1c   : > { %p44_p3 = scmp.ge.s32.totalorder %s3094_s17, 3  ;;  %p96_p4 = scmp.ne.s32.totalorder %s2329_s28, %s2325_s27 }
  0x1d   : > { %p2496_p5 = por %p63_p2, %p62_p1  ;;  %p97_p6 = scmp.eq.s32.totalorder %s3025_s14, 0 }
  0x1e   : > { %s3096_s17 = smov (%p44_p3, %s3094_s17), 0  ;;  %s3098_s18 = smov (!%p44_p3, %s46_s18), %s2357_s12 }
  0x1f   : > { %3051 = sst [smem:[#allocation32_spill]] %s3096_s17  ;;  %s50_s22 = ssub.s32 %s2353_s11, %s3096_s17 }
  0x20   : > { %p2507_p7 = por %p97_p6, %p96_p4  ;;  %p48_p8 = scmp.ge.s32.totalorder %s3098_s18, 3 }
  0x21   : > { %s52_s27 = sor.u32 %s51_s20, %s50_s22  ;;  %s163_s15 = sadd.s32 1, %s2321_s26 }
  0x22   : > { %p53_p9 = scmp.eq.s32.totalorder %s52_s27, 0  ;;  %s3100_s18 = smov (%p48_p8, %s3098_s18), 0 }
  0x23   : > { %3053 = sst [smem:[#allocation33_spill]] %s3100_s18  ;;  %s159_s16 = ssub.s32 %s2357_s12, %s3100_s18 }
  0x24   : > { %s2515_s14 = scalar_select %p53_p9, %s2333_s29, %s55_s19  }
  0x25   : > { %p173_p10 = scmp.ne.s32.totalorder %s2321_s26, %s2317_s25  ;;  %s160_s7 = sor.u32 %s159_s16, %s50_s22 }
  0x26   : > { %3054 = sst [smem:[#allocation34_spill]] %s2515_s14  ;;  %s3055_s6 = sadd.s32 4294967295, %s2361_s13  }
  0x27   : > { %p174_p11 = scmp.eq.s32.totalorder %s3055_s6, 26  ;;  %p161_p12 = scmp.eq.s32.totalorder %s160_s7, 0 }
  0x28   : > { %p179_p13 = scmp.ne.s32.totalorder %s2317_s25, %s2313_s24  ;;  %s3057_s5 = sadd.s32 4294967294, %s2361_s13  }
  0x29   : > { %p2525_p0 = por %p174_p11, %p173_p10  ;;  %p180_p1 = scmp.eq.s32.totalorder %s3057_s5, 26 }
  0x2a   : > { %s2532_s20 = scalar_select %p161_p12, %s2321_s26, %s163_s15  }
  0x2b   : > { %s3056_s17 = scalar_select %p2525_p0, 1, 0 }
  0x2c   : > { %3058 = sst [smem:[#allocation35_spill]] %s2532_s20  ;;  %p2534_p2 = por %p180_p1, %p179_p13 }
  0x2d   : > { %p1797_p3 = scmp.ge.s32.totalorder %s2361_s13, 27 }
  0x2e   : > { %s3059_s27 = scalar_select %p2534_p2, 1, 0 }
  0x2f   : > { %224 = sbr.rel (%p1797_p3) target bundleno = 105 (0x69), region = 16 }
  0x36   : > { %227 = sbr.rel (!%p2496_p5) target bundleno = 74 (0x4a), region = 20  ;;  %s229_s6 = sand.u32 (%p2496_p5), 1, %s2333_s29  }
  0x37   : > { %s1945_s7 = smul.u32 (%p2496_p5), 48, %s2353_s11  ;;  %s1798_s16 = sshll.u32 (%p2496_p5), %s229_s6, 6 }
  0x38   : > { %s3060_s0 = sld [smem:[#allocation36_spill]] (%p2496_p5)  ;;  %s231_s6 = scalar_lea.vmem (%p2496_p5), [#allocation9], %s1798_s16 }
  0x39   : > { %s234_s19 = sadd.s32 (%p2496_p5), %s2349_s10, %s1945_s7 }
  0x3a   : > { %s1801_s5 = sshll.u32 (%p2496_p5), %s234_s19, 2 }
  0x3e   : > { %s2547_s18 = scalar_lea.vmem %s3060_s0, %s1801_s5 }
  0x3f   : > { %v252_v0 = vld [vmem:[%s2547_s18] sm:$0xf]  ;;  %v254_v1 = vld [vmem:[%s2547_s18 + $0xc] sm:$0xf]  ;;  %v256_v2 = vld [vmem:[%s2547_s18 + $0x18] sm:$0xf] }
  0x40   : > { %253 = vst [vmem:[%s231_s6] sm:$0xf] %v252_v0  ;;  %255 = vst [vmem:[%s231_s6 + $0x4] sm:$0xf] %v254_v1  ;;  %v258_v3 = vld [vmem:[%s2547_s18 + $0x24] sm:$0xf] }
  0x41   : > { %257 = vst [vmem:[%s231_s6 + $0x8] sm:$0xf] %v256_v2  ;;  %v260_v4 = vld [vmem:[%s2547_s18 + $0x30] sm:$0xf]  ;;  %v262_v5 = vld [vmem:[%s2547_s18 + $0x3c] sm:$0xf] }
  0x42   : > { %259 = vst [vmem:[%s231_s6 + $0xc] sm:$0xf] %v258_v3  ;;  %261 = vst [vmem:[%s231_s6 + $0x10] sm:$0xf] %v260_v4  ;;  %v264_v6 = vld [vmem:[%s2547_s18 + $0x48] sm:$0xf] }
  0x43   : > { %263 = vst [vmem:[%s231_s6 + $0x14] sm:$0xf] %v262_v5  ;;  %v266_v7 = vld [vmem:[%s2547_s18 + $0x54] sm:$0xf]  ;;  %v268_v8 = vld [vmem:[%s2547_s18 + $0x60] sm:$0xf] }
  0x44   : > { %265 = vst [vmem:[%s231_s6 + $0x18] sm:$0xf] %v264_v6  ;;  %267 = vst [vmem:[%s231_s6 + $0x1c] sm:$0xf] %v266_v7  ;;  %v270_v9 = vld [vmem:[%s2547_s18 + $0x6c] sm:$0xf] }
  0x45   : > { %269 = vst [vmem:[%s231_s6 + $0x20] sm:$0xf] %v268_v8  ;;  %v272_v10 = vld [vmem:[%s2547_s18 + $0x78] sm:$0xf]  ;;  %v274_v11 = vld [vmem:[%s2547_s18 + $0x84] sm:$0xf] }
  0x46   : > { %271 = vst [vmem:[%s231_s6 + $0x24] sm:$0xf] %v270_v9  ;;  %273 = vst [vmem:[%s231_s6 + $0x28] sm:$0xf] %v272_v10  ;;  %v276_v12 = vld [vmem:[%s2547_s18 + $0x90] sm:$0xf] }
  0x47   : > { %275 = vst [vmem:[%s231_s6 + $0x2c] sm:$0xf] %v274_v11  ;;  %v278_v13 = vld [vmem:[%s2547_s18 + $0x9c] sm:$0xf]  ;;  %v280_v14 = vld [vmem:[%s2547_s18 + $0xa8] sm:$0xf] }
  0x48   : > { %277 = vst [vmem:[%s231_s6 + $0x30] sm:$0xf] %v276_v12  ;;  %279 = vst [vmem:[%s231_s6 + $0x34] sm:$0xf] %v278_v13  ;;  %v282_v15 = vld [vmem:[%s2547_s18 + $0xb4] sm:$0xf] }
  0x49   : > { %281 = vst [vmem:[%s231_s6 + $0x38] sm:$0xf] %v280_v14  ;;  %283 = vst [vmem:[%s231_s6 + $0x3c] sm:$0xf] %v282_v15 }
  0x4a PF: > { %s339_s7 = sand.u32 1, %s2333_s29   ;;  %s1946_s16 = smul.u32 48, %s2353_s11 }
  0x4b   : > { %s1802_s19 = sshll.u32 %s339_s7, 6  ;;  %s3061_s1 = sld [smem:[#allocation37_spill]] }
  0x4c   : > { %s349_s5 = sadd.s32 %s2349_s10, %s1946_s16  ;;  %s343_s22 = scalar_lea.vmem [#allocation10], %s1802_s19 }
  0x4d   : > { %s1805_s15 = sshll.u32 %s349_s5, 6  ;;  %s352_s0 = sshll.u32 %s343_s22, 4  ;;  %s2573_s0 = int_to_ptr.vmem [resolvable:$true] %s352_s0 }
  0x4e   : > { %s2575_s18 = scalar_lea.sflag [#allocation11], %s339_s7 }
  0x51   : > { %s2571_s20 = scalar_lea.hbm %s3061_s1, %s1805_s15  ;;  %s2103_s5 = scalar_lea.hbm %s3061_s1, 9216 }
  0x52   : > { %s2099_s6 = scalar_lea.hbm %s2571_s20, 1024  ;;  %p2104_p9 = scmp.lt.u32.totalorder %s2571_s20, %s3061_s1 }
  0x53   : > { %p2100_p4 = scmp.ne.s32.totalorder %s2571_s20, %s2099_s6  ;;  %p2105_p10 = scmp.lt.u32.totalorder %s2103_s5, %s2099_s6 }
  0x54   : > { %p2107_p12 = scmp.lt.u32.totalorder %s2099_s6, %s2571_s20 }
  0x55   : > { %p2101_p6 = pnand %p2100_p4, %p2496_p5  ;;  %p2106_p11 = por %p2105_p10, %p2104_p9 }
  0x57   : > { %p2102_p8 = pneg %p2101_p6  ;;  %p2108_p13 = por %p2107_p12, %p2106_p11 }
  0x59   : > { %p2109_p1 = pnand %p2108_p13, %p2102_p8 }
  0x5b   : > { %2112 = shalt.err (!%p2109_p1)
}
  0x5c   : > { %s2113_s7 = scalar_lea.vmem %s2573_s0, 1024  ;;  %s2363_s15 = smov [#allocation10]  }
  0x5d   : > { %p2114_p3 = scmp.ne.s32.totalorder %s2573_s0, %s2113_s7  ;;  %s2117_s22 = sshll.u32 %s2363_s15, 4  ;;  %s2118_s22 = int_to_ptr.vmem [resolvable:$false] %s2117_s22 }
  0x5e   : > { %s2119_s16 = scalar_lea.vmem %s2118_s22, 2048  ;;  %p2120_p2 = scmp.lt.s32.totalorder %s2573_s0, %s2118_s22 }
  0x5f   : > { %p2115_p4 = pnand %p2114_p3, %p2496_p5  ;;  %p2121_p0 = scmp.lt.s32.totalorder %s2119_s16, %s2113_s7 }
  0x61   : > { %p2116_p6 = pneg %p2115_p4  ;;  %p2122_p9 = por %p2121_p0, %p2120_p2 }
  0x63   : > { %p2123_p10 = pnand %p2122_p9, %p2116_p6 }
  0x65   : > { %2126 = shalt.err (!%p2123_p10)
}
  0x66   : > { %s2364_s6 = smov 192   ;;  %s2365_s19 = smov 64  }
  0x67   : > { %s2366_s5 = smov 4  }
  0x68   : > { %1949 = dma.hbm_to_vmem [thread:$0]  (%p2496_p5), %s2571_s20, 1024, %s2573_s0, %s2575_s18, %s2364_s6, %s2365_s19, %s2366_s5  }
  0x69 PF: > { %p1806_p8 = scmp.ge.s32.totalorder %s2361_s13, 1  ;;  %p378_p11 = scmp.lt.s32.totalorder %s2361_s13, 28 }
  0x6b   : > { %p379_p12 = pnand %p1806_p8, %p378_p11 }
  0x6c   : > { %s385_s12 = sand.u32 (!%p379_p12), 1, %s2329_s28  }
  0x6d   : > { %382 = sbr.rel (%p379_p12) target bundleno = 775 (0x307), region = 73  ;;  %s1807_s14 = sshll.u32 (!%p379_p12), %s385_s12, 6 }
  0x6e   : > { %s2602_s7 = scalar_lea.vmem (!%p379_p12), [#allocation9], %s1807_s14  ;;  %s392_s15 = scalar_lea.sflag (!%p379_p12), [#allocation11], %s385_s12 }
  0x6f   : > { %s2604_s22 = scalar_lea.vmem (!%p379_p12), [#allocation10], %s1807_s14 }
  0x74   : > { %2292 = dma.done.wait (%p2507_p7), %s392_s15, 1024  }
  0x75   : > { %2294 = vsyncadd (%p2507_p7), %s392_s15, 4294966272  ;;  %s2611_s0 = sand.u32 1, %s2317_s25   ;;  %s1811_s21 = sshll.u32 %s2341_s8, 4 }
  0x76   : > { %p444_p5 = scmp.lt.s32.totalorder %s1811_s21, 47  ;;  %s2616_s18 = sshll.u32 %s2341_s8, 7 }
  0x77   : > { %s3062_s2 = sld [smem:[#allocation38_spill]]  ;;  %s3063_s3 = sld [smem:[#allocation39_spill]] }
  0x78   : > { %s3102_s21 = smov (!%p444_p5, %s1811_s21), 47  ;;  %p461_p7 = scmp.eq.s32.totalorder %s2341_s8, 0 }
  0x79   : > { %s1812_s6 = sshll.u32 %s3102_s21, 3  ;;  %p462_p0 = scmp.eq.s32.totalorder %s2337_s30, 0 }
  0x7a   : > { %p460_p2 = scmp.eq.s32.totalorder %s2345_s9, 0  ;;  %s2367_s16 = smov [#allocation2]  }
  0x7b   : > { %p2632_p13 = pnand %p462_p0, %p461_p7  ;;  %s476_s21 = sshll.u32 %s2367_s16, 4  ;;  %s477_s21 = int_to_ptr.vmem [resolvable:$true] %s476_s21 }
  0x7c   : > { %s2368_s23 = smov [#allocation3]   ;;  %s2127_s14 = scalar_lea.hbm %s3021_s4, 6144 }
  0x7d   : > { %s2622_s5 = scalar_lea.vmem %s3062_s2, %s1812_s6  ;;  %s2627_s15 = scalar_lea.vmem %s3063_s3, %s1812_s6 }
  0x7e   : > { %s3064_s20 = scalar_select %p2632_p13, 1, 0 }
  0x7f   : > { %p464_p1 = pneg %p2632_p13  ;;  %s488_s19 = sshll.u32 %s2368_s23, 4  ;;  %s2642_s19 = int_to_ptr.vmem [resolvable:$true] %s488_s19 }
  0x80   : > { %p2128_p4 = scmp.ne.s32.totalorder %s3021_s4, %s2127_s14  ;;  %p2134_p8 = scmp.lt.u32.totalorder %s2127_s14, %s3021_s4 }
  0x81   : > { %p2638_p3 = pnand %p464_p1, %p460_p2 }
  0x83   : > { %p2129_p6 = pneg %p2638_p3 }
  0x85   : > { %p2130_p9 = pnand %p2129_p6, %p2128_p4 }
  0x87   : > { %p2131_p10 = pneg %p2130_p9 }
  0x89   : > { %p2136_p11 = pnand %p2134_p8, %p2131_p10 }
  0x8b   : > { %2139 = shalt.err (!%p2136_p11)  }
  0x8c   : > { %s2140_s11 = scalar_lea.vmem %s477_s21, 6144  ;;  %p2148_p0 = scmp.lt.s32.totalorder %s477_s21, %s477_s21 }
  0x8d   : > { %p2141_p12 = scmp.ne.s32.totalorder %s477_s21, %s2140_s11  ;;  %p2149_p2 = scmp.lt.s32.totalorder %s2140_s11, %s2140_s11 }
  0x8f   : > { %p2143_p5 = pnand %p2141_p12, %p2129_p6  ;;  %p2150_p1 = por %p2149_p2, %p2148_p0 }
  0x91   : > { %p2144_p7 = pneg %p2143_p5 }
  0x93   : > { %p2151_p13 = pnand %p2150_p1, %p2144_p7 }
  0x95   : > { %2154 = shalt.err (!%p2151_p13)  }
  0x96   : > { %1952 = dma.hbm_to_vmem [thread:$0]  (!%p2638_p3), %s3021_s4, 6144, %s477_s21, [#allocation8] }
  0x97   : > { %s3066_s14 = sld [smem:[#allocation40_spill]] }
  0x9d   : > { %s2155_s16 = scalar_lea.hbm %s3066_s14, 6144 }
  0x9e   : > { %p2156_p4 = scmp.ne.s32.totalorder %s3066_s14, %s2155_s16  ;;  %p2162_p13 = scmp.lt.u32.totalorder %s2155_s16, %s3066_s14 }
  0xa0   : > { %p2158_p9 = pnand %p2156_p4, %p2129_p6 }
  0xa2   : > { %p2159_p10 = pneg %p2158_p9 }
  0xa4   : > { %p2164_p8 = pnand %p2162_p13, %p2159_p10 }
  0xa6   : > { %2167 = shalt.err (!%p2164_p8)  }
  0xa7   : > { %s2168_s21 = scalar_lea.vmem %s2642_s19, 6144  ;;  %p2176_p7 = scmp.lt.s32.totalorder %s2642_s19, %s2642_s19 }
  0xa8   : > { %p2169_p11 = scmp.ne.s32.totalorder %s2642_s19, %s2168_s21  ;;  %p2177_p0 = scmp.lt.s32.totalorder %s2168_s21, %s2168_s21 }
  0xaa   : > { %p2171_p12 = pnand %p2169_p11, %p2129_p6  ;;  %p2178_p2 = por %p2177_p0, %p2176_p7 }
  0xac   : > { %p2172_p5 = pneg %p2171_p12 }
  0xae   : > { %p2179_p1 = pnand %p2178_p2, %p2172_p5 }
  0xb0   : > { %2182 = shalt.err (!%p2179_p1)  }
  0xb1   : > { %1953 = dma.hbm_to_vmem [thread:$0]  (!%p2638_p3), %s3066_s14, 6144, %s2642_s19, [#allocation8 + $0x1] }
  0xb2   : > { %s3067_s2 = sshll.u32 %s2611_s0, 7 }
  0xb3   : > { %s2693_s3 = scalar_lea.vmem [#allocation13], %s3067_s2  ;;  %s3068_s6 = smov %s3067_s2 }
  0xb4   : > { %s2697_s12 = scalar_lea.vmem [#allocation14], %s3068_s6 }
  0xb5   : > { %2296 = dma.done.wait (!%p2638_p3), [#allocation8], 6144 }
  0xb6   : > { %2298 = vsyncadd (!%p2638_p3), [#allocation8], 4294961152 }
  0xb7   : > { %2300 = dma.done.wait (!%p2638_p3), [#allocation8 + $0x1], 6144 }
  0xb8   : > { %2302 = vsyncadd (!%p2638_p3), [#allocation8 + $0x1], 4294961152  ;;  %p3069_p6 = scmp.ne.s32.totalorder %s3064_s20, 0 }
  0xb9   : > { %v499_v16 = vld [vmem:[#allocation2] sm:$0xff] (!%p3069_p6)  ;;  %v500_v17 = vld [vmem:[#allocation2 + $0x8] sm:$0xff] (!%p3069_p6)  ;;  %v501_v18 = vld [vmem:[#allocation2 + $0x10] sm:$0xff] (!%p3069_p6) }
  0xba   : > { %498 = sbr.rel (%p3069_p6) target bundleno = 224 (0xe0), region = 97  ;;  %v547_v19 = vpack.c.bf16 (!%p3069_p6), %v500_v17, %v499_v16  ;;  %v502_v20 = vld [vmem:[#allocation2 + $0x18] sm:$0xff] (!%p3069_p6)  ;;  %v503_v21 = vld [vmem:[#allocation2 + $0x20] sm:$0xff] (!%p3069_p6)  ;;  %v504_v22 = vld [vmem:[#allocation2 + $0x28] sm:$0xff] (!%p3069_p6) }
  0xbb   : > { %v548_v23 = vpack.c.bf16 (!%p3069_p6), %v502_v20, %v501_v18  ;;  %v549_v24 = vpack.c.bf16 (!%p3069_p6), %v504_v22, %v503_v21  ;;  %v505_v25 = vld [vmem:[#allocation2 + $0x30] sm:$0xff] (!%p3069_p6)  ;;  %v506_v26 = vld [vmem:[#allocation2 + $0x38] sm:$0xff] (!%p3069_p6)  ;;  %v507_v27 = vld [vmem:[#allocation2 + $0x40] sm:$0xff] (!%p3069_p6) }
  0xbc   : > { %571 = vst [vmem:[#allocation4] sm:$0xff] (!%p3069_p6), %v547_v19  ;;  %v550_v28 = vpack.c.bf16 (!%p3069_p6), %v506_v26, %v505_v25  ;;  %v508_v29 = vld [vmem:[#allocation2 + $0x48] sm:$0xff] (!%p3069_p6)  ;;  %v509_v30 = vld [vmem:[#allocation2 + $0x50] sm:$0xff] (!%p3069_p6)  ;;  %v510_v31 = vld [vmem:[#allocation2 + $0x58] sm:$0xff] (!%p3069_p6) }
  0xbd   : > { %572 = vst [vmem:[#allocation4 + $0x8] sm:$0xff] (!%p3069_p6), %v548_v23  ;;  %573 = vst [vmem:[#allocation4 + $0x10] sm:$0xff] (!%p3069_p6), %v549_v24  ;;  %v551_v32 = vpack.c.bf16 (!%p3069_p6), %v508_v29, %v507_v27  ;;  %v552_v33 = vpack.c.bf16 (!%p3069_p6), %v510_v31, %v509_v30  ;;  %v511_v34 = vld [vmem:[#allocation2 + $0x60] sm:$0xff] (!%p3069_p6)  ;;  %v512_v35 = vld [vmem:[#allocation2 + $0x68] sm:$0xff] (!%p3069_p6) }
  0xbe   : > { %v513_v36 = vld [vmem:[#allocation2 + $0x70] sm:$0xff] (!%p3069_p6)  ;;  %574 = vst [vmem:[#allocation4 + $0x18] sm:$0xff] (!%p3069_p6), %v550_v28  ;;  %v553_v37 = vpack.c.bf16 (!%p3069_p6), %v512_v35, %v511_v34  ;;  %v514_v38 = vld [vmem:[#allocation2 + $0x78] sm:$0xff] (!%p3069_p6)  ;;  %v515_v39 = vld [vmem:[#allocation2 + $0x80] sm:$0xff] (!%p3069_p6) }
  0xbf   : > { %v516_v40 = vld [vmem:[#allocation2 + $0x88] sm:$0xff] (!%p3069_p6)  ;;  %575 = vst [vmem:[#allocation4 + $0x20] sm:$0xff] (!%p3069_p6), %v551_v32  ;;  %576 = vst [vmem:[#allocation4 + $0x28] sm:$0xff] (!%p3069_p6), %v552_v33  ;;  %v554_v41 = vpack.c.bf16 (!%p3069_p6), %v514_v38, %v513_v36  ;;  %v517_v43 = vld [vmem:[#allocation2 + $0x90] sm:$0xff] (!%p3069_p6) }
  0xc0   : > { %v555_v42 = vpack.c.bf16 (!%p3069_p6), %v516_v40, %v515_v39  ;;  %v518_v44 = vld [vmem:[#allocation2 + $0x98] sm:$0xff] (!%p3069_p6)  ;;  %v519_v45 = vld [vmem:[#allocation2 + $0xa0] sm:$0xff] (!%p3069_p6)  ;;  %577 = vst [vmem:[#allocation4 + $0x30] sm:$0xff] (!%p3069_p6), %v553_v37  ;;  %v520_v47 = vld [vmem:[#allocation2 + $0xa8] sm:$0xff] (!%p3069_p6) }
  0xc1   : > { %v556_v46 = vpack.c.bf16 %v518_v44, %v517_v43  ;;  %v521_v48 = vld [vmem:[#allocation2 + $0xb0] sm:$0xff]  ;;  %v522_v49 = vld [vmem:[#allocation2 + $0xb8] sm:$0xff]  ;;  %578 = vst [vmem:[#allocation4 + $0x38] sm:$0xff] %v554_v41  ;;  %v557_v50 = vpack.c.bf16 %v520_v47, %v519_v45  ;;  %v523_v52 = vld [vmem:[#allocation2 + $0xc0] sm:$0xff] }
  0xc2   : > { %579 = vst [vmem:[#allocation4 + $0x40] sm:$0xff] %v555_v42  ;;  %v558_v51 = vpack.c.bf16 %v522_v49, %v521_v48  ;;  %v524_v53 = vld [vmem:[#allocation2 + $0xc8] sm:$0xff]  ;;  %v525_v54 = vld [vmem:[#allocation2 + $0xd0] sm:$0xff]  ;;  %v526_v56 = vld [vmem:[#allocation2 + $0xd8] sm:$0xff] }
  0xc3   : > { %580 = vst [vmem:[#allocation4 + $0x48] sm:$0xff] %v556_v46  ;;  %v559_v55 = vpack.c.bf16 %v524_v53, %v523_v52  ;;  %v527_v57 = vld [vmem:[#allocation2 + $0xe0] sm:$0xff]  ;;  %v528_v58 = vld [vmem:[#allocation2 + $0xe8] sm:$0xff]  ;;  %581 = vst [vmem:[#allocation4 + $0x50] sm:$0xff] %v557_v50  ;;  %v560_v59 = vpack.c.bf16 %v526_v56, %v525_v54 }
  0xc4   : > { %582 = vst [vmem:[#allocation4 + $0x58] sm:$0xff] %v558_v51  ;;  %v561_v60 = vpack.c.bf16 %v528_v58, %v527_v57  ;;  %v529_v61 = vld [vmem:[#allocation2 + $0xf0] sm:$0xff]  ;;  %v530_v62 = vld [vmem:[#allocation2 + $0xf8] sm:$0xff]  ;;  %v531_v63 = vld [vmem:[#allocation2 + $0x100] sm:$0xff] }
  0xc5   : > { %583 = vst [vmem:[#allocation4 + $0x60] sm:$0xff] %v559_v55  ;;  %v562_v0 = vpack.c.bf16 %v530_v62, %v529_v61  ;;  %v532_v1 = vld [vmem:[#allocation2 + $0x108] sm:$0xff]  ;;  %v533_v2 = vld [vmem:[#allocation2 + $0x110] sm:$0xff]  ;;  %v534_v3 = vld [vmem:[#allocation2 + $0x118] sm:$0xff] }
  0xc6   : > { %584 = vst [vmem:[#allocation4 + $0x68] sm:$0xff] %v560_v59  ;;  %585 = vst [vmem:[#allocation4 + $0x70] sm:$0xff] %v561_v60  ;;  %v563_v4 = vpack.c.bf16 %v532_v1, %v531_v63  ;;  %v564_v5 = vpack.c.bf16 %v534_v3, %v533_v2  ;;  %v535_v6 = vld [vmem:[#allocation2 + $0x120] sm:$0xff]  ;;  %v536_v7 = vld [vmem:[#allocation2 + $0x128] sm:$0xff] }
  0xc7   : > { %v537_v8 = vld [vmem:[#allocation2 + $0x130] sm:$0xff]  ;;  %586 = vst [vmem:[#allocation4 + $0x78] sm:$0xff] %v562_v0  ;;  %v565_v9 = vpack.c.bf16 %v536_v7, %v535_v6  ;;  %v538_v10 = vld [vmem:[#allocation2 + $0x138] sm:$0xff]  ;;  %v539_v11 = vld [vmem:[#allocation2 + $0x140] sm:$0xff] }
  0xc8   : > { %v540_v12 = vld [vmem:[#allocation2 + $0x148] sm:$0xff]  ;;  %587 = vst [vmem:[#allocation4 + $0x80] sm:$0xff] %v563_v4  ;;  %588 = vst [vmem:[#allocation4 + $0x88] sm:$0xff] %v564_v5  ;;  %v566_v13 = vpack.c.bf16 %v538_v10, %v537_v8  ;;  %v541_v15 = vld [vmem:[#allocation2 + $0x150] sm:$0xff] }
  0xc9   : > { %v567_v14 = vpack.c.bf16 %v540_v12, %v539_v11  ;;  %v542_v16 = vld [vmem:[#allocation2 + $0x158] sm:$0xff]  ;;  %v543_v17 = vld [vmem:[#allocation2 + $0x160] sm:$0xff]  ;;  %589 = vst [vmem:[#allocation4 + $0x90] sm:$0xff] %v565_v9  ;;  %v544_v19 = vld [vmem:[#allocation2 + $0x168] sm:$0xff] }
  0xca   : > { %v568_v18 = vpack.c.bf16 %v542_v16, %v541_v15  ;;  %v545_v20 = vld [vmem:[#allocation2 + $0x170] sm:$0xff]  ;;  %v546_v21 = vld [vmem:[#allocation2 + $0x178] sm:$0xff]  ;;  %590 = vst [vmem:[#allocation4 + $0x98] sm:$0xff] %v566_v13  ;;  %v569_v22 = vpack.c.bf16 %v544_v19, %v543_v17  ;;  %v595_v24 = vld [vmem:[#allocation3] sm:$0xff] }
  0xcb   : > { %591 = vst [vmem:[#allocation4 + $0xa0] sm:$0xff] %v567_v14  ;;  %v570_v23 = vpack.c.bf16 %v546_v21, %v545_v20  ;;  %v596_v25 = vld [vmem:[#allocation3 + $0x8] sm:$0xff]  ;;  %v597_v26 = vld [vmem:[#allocation3 + $0x10] sm:$0xff]  ;;  %v598_v28 = vld [vmem:[#allocation3 + $0x18] sm:$0xff] }
  0xcc   : > { %592 = vst [vmem:[#allocation4 + $0xa8] sm:$0xff] %v568_v18  ;;  %v643_v27 = vpack.c.bf16 %v596_v25, %v595_v24  ;;  %v599_v29 = vld [vmem:[#allocation3 + $0x20] sm:$0xff]  ;;  %v600_v30 = vld [vmem:[#allocation3 + $0x28] sm:$0xff]  ;;  %593 = vst [vmem:[#allocation4 + $0xb0] sm:$0xff] %v569_v22  ;;  %v644_v31 = vpack.c.bf16 %v598_v28, %v597_v26 }
  0xcd   : > { %594 = vst [vmem:[#allocation4 + $0xb8] sm:$0xff] %v570_v23  ;;  %v645_v32 = vpack.c.bf16 %v600_v30, %v599_v29  ;;  %v601_v33 = vld [vmem:[#allocation3 + $0x30] sm:$0xff]  ;;  %v602_v34 = vld [vmem:[#allocation3 + $0x38] sm:$0xff]  ;;  %v603_v35 = vld [vmem:[#allocation3 + $0x40] sm:$0xff] }
  0xce   : > { %667 = vst [vmem:[#allocation5] sm:$0xff] %v643_v27  ;;  %v646_v36 = vpack.c.bf16 %v602_v34, %v601_v33  ;;  %v604_v37 = vld [vmem:[#allocation3 + $0x48] sm:$0xff]  ;;  %v605_v38 = vld [vmem:[#allocation3 + $0x50] sm:$0xff]  ;;  %v606_v39 = vld [vmem:[#allocation3 + $0x58] sm:$0xff] }
  0xcf   : > { %668 = vst [vmem:[#allocation5 + $0x8] sm:$0xff] %v644_v31  ;;  %669 = vst [vmem:[#allocation5 + $0x10] sm:$0xff] %v645_v32  ;;  %v647_v40 = vpack.c.bf16 %v604_v37, %v603_v35  ;;  %v648_v41 = vpack.c.bf16 %v606_v39, %v605_v38  ;;  %v607_v42 = vld [vmem:[#allocation3 + $0x60] sm:$0xff]  ;;  %v608_v43 = vld [vmem:[#allocation3 + $0x68] sm:$0xff] }
  0xd0   : > { %v609_v44 = vld [vmem:[#allocation3 + $0x70] sm:$0xff]  ;;  %670 = vst [vmem:[#allocation5 + $0x18] sm:$0xff] %v646_v36  ;;  %v649_v45 = vpack.c.bf16 %v608_v43, %v607_v42  ;;  %v610_v46 = vld [vmem:[#allocation3 + $0x78] sm:$0xff]  ;;  %v611_v47 = vld [vmem:[#allocation3 + $0x80] sm:$0xff] }
  0xd1   : > { %v612_v48 = vld [vmem:[#allocation3 + $0x88] sm:$0xff]  ;;  %671 = vst [vmem:[#allocation5 + $0x20] sm:$0xff] %v647_v40  ;;  %672 = vst [vmem:[#allocation5 + $0x28] sm:$0xff] %v648_v41  ;;  %v650_v49 = vpack.c.bf16 %v610_v46, %v609_v44  ;;  %v613_v51 = vld [vmem:[#allocation3 + $0x90] sm:$0xff] }
  0xd2   : > { %v651_v50 = vpack.c.bf16 %v612_v48, %v611_v47  ;;  %v614_v52 = vld [vmem:[#allocation3 + $0x98] sm:$0xff]  ;;  %v615_v53 = vld [vmem:[#allocation3 + $0xa0] sm:$0xff]  ;;  %673 = vst [vmem:[#allocation5 + $0x30] sm:$0xff] %v649_v45  ;;  %v616_v55 = vld [vmem:[#allocation3 + $0xa8] sm:$0xff] }
  0xd3   : > { %v652_v54 = vpack.c.bf16 %v614_v52, %v613_v51  ;;  %v617_v56 = vld [vmem:[#allocation3 + $0xb0] sm:$0xff]  ;;  %v618_v57 = vld [vmem:[#allocation3 + $0xb8] sm:$0xff]  ;;  %674 = vst [vmem:[#allocation5 + $0x38] sm:$0xff] %v650_v49  ;;  %v653_v58 = vpack.c.bf16 %v616_v55, %v615_v53  ;;  %v619_v60 = vld [vmem:[#allocation3 + $0xc0] sm:$0xff] }
  0xd4   : > { %675 = vst [vmem:[#allocation5 + $0x40] sm:$0xff] %v651_v50  ;;  %v654_v59 = vpack.c.bf16 %v618_v57, %v617_v56  ;;  %v620_v61 = vld [vmem:[#allocation3 + $0xc8] sm:$0xff]  ;;  %v621_v62 = vld [vmem:[#allocation3 + $0xd0] sm:$0xff]  ;;  %v622_v0 = vld [vmem:[#allocation3 + $0xd8] sm:$0xff] }
  0xd5   : > { %676 = vst [vmem:[#allocation5 + $0x48] sm:$0xff] %v652_v54  ;;  %v655_v63 = vpack.c.bf16 %v620_v61, %v619_v60  ;;  %v623_v1 = vld [vmem:[#allocation3 + $0xe0] sm:$0xff]  ;;  %v624_v2 = vld [vmem:[#allocation3 + $0xe8] sm:$0xff]  ;;  %677 = vst [vmem:[#allocation5 + $0x50] sm:$0xff] %v653_v58  ;;  %v656_v3 = vpack.c.bf16 %v622_v0, %v621_v62 }
  0xd6   : > { %678 = vst [vmem:[#allocation5 + $0x58] sm:$0xff] %v654_v59  ;;  %v657_v4 = vpack.c.bf16 %v624_v2, %v623_v1  ;;  %v625_v5 = vld [vmem:[#allocation3 + $0xf0] sm:$0xff]  ;;  %v626_v6 = vld [vmem:[#allocation3 + $0xf8] sm:$0xff]  ;;  %v627_v7 = vld [vmem:[#allocation3 + $0x100] sm:$0xff] }
  0xd7   : > { %679 = vst [vmem:[#allocation5 + $0x60] sm:$0xff] %v655_v63  ;;  %v658_v8 = vpack.c.bf16 %v626_v6, %v625_v5  ;;  %v628_v9 = vld [vmem:[#allocation3 + $0x108] sm:$0xff]  ;;  %v629_v10 = vld [vmem:[#allocation3 + $0x110] sm:$0xff]  ;;  %v630_v11 = vld [vmem:[#allocation3 + $0x118] sm:$0xff] }
  0xd8   : > { %680 = vst [vmem:[#allocation5 + $0x68] sm:$0xff] %v656_v3  ;;  %681 = vst [vmem:[#allocation5 + $0x70] sm:$0xff] %v657_v4  ;;  %v659_v12 = vpack.c.bf16 %v628_v9, %v627_v7  ;;  %v660_v13 = vpack.c.bf16 %v630_v11, %v629_v10  ;;  %v631_v14 = vld [vmem:[#allocation3 + $0x120] sm:$0xff]  ;;  %v632_v15 = vld [vmem:[#allocation3 + $0x128] sm:$0xff] }
  0xd9   : > { %v633_v16 = vld [vmem:[#allocation3 + $0x130] sm:$0xff]  ;;  %682 = vst [vmem:[#allocation5 + $0x78] sm:$0xff] %v658_v8  ;;  %v661_v17 = vpack.c.bf16 %v632_v15, %v631_v14  ;;  %v634_v18 = vld [vmem:[#allocation3 + $0x138] sm:$0xff]  ;;  %v635_v19 = vld [vmem:[#allocation3 + $0x140] sm:$0xff] }
  0xda   : > { %v636_v20 = vld [vmem:[#allocation3 + $0x148] sm:$0xff]  ;;  %683 = vst [vmem:[#allocation5 + $0x80] sm:$0xff] %v659_v12  ;;  %684 = vst [vmem:[#allocation5 + $0x88] sm:$0xff] %v660_v13  ;;  %v662_v21 = vpack.c.bf16 %v634_v18, %v633_v16  ;;  %v637_v23 = vld [vmem:[#allocation3 + $0x150] sm:$0xff] }
  0xdb   : > { %v663_v22 = vpack.c.bf16 %v636_v20, %v635_v19  ;;  %v638_v24 = vld [vmem:[#allocation3 + $0x158] sm:$0xff]  ;;  %v639_v25 = vld [vmem:[#allocation3 + $0x160] sm:$0xff]  ;;  %685 = vst [vmem:[#allocation5 + $0x90] sm:$0xff] %v661_v17  ;;  %v640_v27 = vld [vmem:[#allocation3 + $0x168] sm:$0xff] }
  0xdc   : > { %v664_v26 = vpack.c.bf16 %v638_v24, %v637_v23  ;;  %v641_v28 = vld [vmem:[#allocation3 + $0x170] sm:$0xff]  ;;  %v642_v29 = vld [vmem:[#allocation3 + $0x178] sm:$0xff]  ;;  %686 = vst [vmem:[#allocation5 + $0x98] sm:$0xff] %v662_v21  ;;  %v665_v30 = vpack.c.bf16 %v640_v27, %v639_v25 }
  0xdd   : > { %687 = vst [vmem:[#allocation5 + $0xa0] sm:$0xff] %v663_v22  ;;  %v666_v31 = vpack.c.bf16 %v642_v29, %v641_v28 }
  0xde   : > { %688 = vst [vmem:[#allocation5 + $0xa8] sm:$0xff] %v664_v26  ;;  %689 = vst [vmem:[#allocation5 + $0xb0] sm:$0xff] %v665_v30 }
  0xdf   : > { %690 = vst [vmem:[#allocation5 + $0xb8] sm:$0xff] %v666_v31 }
  0xe0 PF: > { %p1817_p3 = scmp.ne.s32.totalorder %s2337_s30, 0 }
  0xe1   : > { %v713_v32 = vld [vmem:[%s2622_s5 + $0x10] sm:$0xff] (!%p1817_p3)  ;;  %v711_v33 = vld [vmem:[%s2622_s5] sm:$0xff] (!%p1817_p3)  ;;  %v2369_v34 = vmov (!%p1817_p3), 0   ;;  %v714_v35 = vld [vmem:[%s2622_s5 + $0x18] sm:$0xff] (!%p1817_p3)  ;;  %s2743_s1 = scalar_lea.vmem (!%p1817_p3), [#allocation2], %s2616_s18  ;;  %s2762_s20 = scalar_lea.vmem (!%p1817_p3), [#allocation3], %s2616_s18 }
  0xe2   : > { %693 = sbr.rel (%p1817_p3) target bundleno = 418 (0x1a2), region = 101  ;;  %2082 = vset.pattern.permute.xlu1 (!%p1817_p3), %v2369_v34  ;;  %2081 = vset.pattern.permute.xlu0 (!%p1817_p3), %v2369_v34  ;;  %v712_v36 = vld [vmem:[%s2622_s5 + $0x8] sm:$0xff] (!%p1817_p3)  ;;  %v715_v38 = vld [vmem:[%s2622_s5 + $0x20] sm:$0xff] (!%p1817_p3)  ;;  %v718_v39 = vld [vmem:[%s2622_s5 + $0x38] sm:$0xff] (!%p1817_p3) }
  0xe3   : > { %739 = vperm.xlu1 (!%p1817_p3), %2082, %v713_v32   ;;  %729 = vperm.xlu0 (!%p1817_p3), %2081, %v711_v33   ;;  %v716_v37 = vld [vmem:[%s2622_s5 + $0x28] sm:$0xff] (!%p1817_p3)  ;;  %v717_v40 = vld [vmem:[%s2622_s5 + $0x30] sm:$0xff] (!%p1817_p3)  ;;  %v719_v42 = vld [vmem:[%s2622_s5 + $0x40] sm:$0xff] (!%p1817_p3) }
  0xe4   : > { %v720_v41 = vld [vmem:[%s2622_s5 + $0x48] sm:$0xff] (!%p1817_p3)  ;;  %v722_v43 = vld [vmem:[%s2622_s5 + $0x58] sm:$0xff] (!%p1817_p3)  ;;  %v721_v44 = vld [vmem:[%s2622_s5 + $0x50] sm:$0xff] (!%p1817_p3) }
  0xe5   : > { %v724_v45 = vld [vmem:[%s2622_s5 + $0x68] sm:$0xff] (!%p1817_p3)  ;;  %v723_v46 = vld [vmem:[%s2622_s5 + $0x60] sm:$0xff] (!%p1817_p3)  ;;  %v726_v47 = vld [vmem:[%s2622_s5 + $0x78] sm:$0xff] (!%p1817_p3) }
  0xe6   : > { %v725_v48 = vld [vmem:[%s2622_s5 + $0x70] sm:$0xff] (!%p1817_p3)  ;;  %v857_v49 = vld [vmem:[%s2627_s15 + $0x8] sm:$0xff] (!%p1817_p3)  ;;  %v856_v50 = vld [vmem:[%s2627_s15] sm:$0xff] (!%p1817_p3) }
  0xe7   : > { %744 = vperm.xlu1 (!%p1817_p3), %2082, %v714_v35   ;;  %734 = vperm.xlu0 (!%p1817_p3), %2081, %v712_v36   ;;  %v859_v51 = vld [vmem:[%s2627_s15 + $0x18] sm:$0xff] (!%p1817_p3)  ;;  %v858_v52 = vld [vmem:[%s2627_s15 + $0x10] sm:$0xff] (!%p1817_p3)  ;;  %v861_v53 = vld [vmem:[%s2627_s15 + $0x28] sm:$0xff] (!%p1817_p3) }
  0xe8   : > { %v860_v54 = vld [vmem:[%s2627_s15 + $0x20] sm:$0xff] (!%p1817_p3)  ;;  %v863_v55 = vld [vmem:[%s2627_s15 + $0x38] sm:$0xff] (!%p1817_p3)  ;;  %v862_v56 = vld [vmem:[%s2627_s15 + $0x30] sm:$0xff] (!%p1817_p3) }
  0xe9   : > { %v865_v57 = vld [vmem:[%s2627_s15 + $0x48] sm:$0xff]  ;;  %v864_v58 = vld [vmem:[%s2627_s15 + $0x40] sm:$0xff]  ;;  %v867_v59 = vld [vmem:[%s2627_s15 + $0x58] sm:$0xff] }
  0xea   : > { %v866_v60 = vld [vmem:[%s2627_s15 + $0x50] sm:$0xff]  ;;  %v869_v61 = vld [vmem:[%s2627_s15 + $0x68] sm:$0xff]  ;;  %v868_v62 = vld [vmem:[%s2627_s15 + $0x60] sm:$0xff] }
  0xeb   : > { %754 = vperm.xlu1 %2082, %v716_v37   ;;  %749 = vperm.xlu0 %2081, %v715_v38   ;;  %v871_v63 = vld [vmem:[%s2627_s15 + $0x78] sm:$0xff]  ;;  %v870_v0 = vld [vmem:[%s2627_s15 + $0x70] sm:$0xff]  ;;  %v695_v2 = vld [vmem:[%s2743_s1] sm:$0xff] }
  0xec   : > { %v697_v1 = vld [vmem:[%s2743_s1 + $0x10] sm:$0xff]  ;;  %v698_v7 = vld [vmem:[%s2743_s1 + $0x18] sm:$0xff]  ;;  %v696_v8 = vld [vmem:[%s2743_s1 + $0x8] sm:$0xff] }
  0xed   : > { %v700_v13 = vld [vmem:[%s2743_s1 + $0x28] sm:$0xff]  ;;  %v699_v14 = vld [vmem:[%s2743_s1 + $0x20] sm:$0xff]  ;;  %v702_v19 = vld [vmem:[%s2743_s1 + $0x38] sm:$0xff] }
  0xee   : > { %v701_v20 = vld [vmem:[%s2743_s1 + $0x30] sm:$0xff]  ;;  %v704_v25 = vld [vmem:[%s2743_s1 + $0x48] sm:$0xff]  ;;  %v703_v26 = vld [vmem:[%s2743_s1 + $0x40] sm:$0xff] }
  0xef   : > { %764 = vperm.xlu1 %2082, %v718_v39   ;;  %759 = vperm.xlu0 %2081, %v717_v40   ;;  %v706_v31 = vld [vmem:[%s2743_s1 + $0x58] sm:$0xff]  ;;  %v705_v32 = vld [vmem:[%s2743_s1 + $0x50] sm:$0xff]  ;;  %v708_v37 = vld [vmem:[%s2743_s1 + $0x68] sm:$0xff] }
  0xf0   : > { %v707_v38 = vld [vmem:[%s2743_s1 + $0x60] sm:$0xff] }
  0xf3   : > { %774 = vperm.xlu1 %2082, %v720_v41   ;;  %769 = vperm.xlu0 %2081, %v719_v42  }
  0xf7   : > { %784 = vperm.xlu1 %2082, %v722_v43   ;;  %779 = vperm.xlu0 %2081, %v721_v44   ;;  %v710_v43 = vld [vmem:[%s2743_s1 + $0x78] sm:$0xff]  ;;  %v709_v44 = vld [vmem:[%s2743_s1 + $0x70] sm:$0xff] }
  0xfb   : > { %794 = vperm.xlu1 %2082, %v724_v45   ;;  %789 = vperm.xlu0 %2081, %v723_v46  }
  0xff   : > { %804 = vperm.xlu1 %2082, %v726_v47   ;;  %799 = vperm.xlu0 %2081, %v725_v48  }
 0x103   : > { %879 = vperm.xlu1 %2082, %v857_v49   ;;  %874 = vperm.xlu0 %2081, %v856_v50   ;;  %v841_v49 = vld [vmem:[%s2762_s20 + $0x8] sm:$0xff]  ;;  %v840_v50 = vld [vmem:[%s2762_s20] sm:$0xff] }
 0x107   : > { %889 = vperm.xlu1 %2082, %v859_v51   ;;  %884 = vperm.xlu0 %2081, %v858_v52  }
 0x10b   : > { %899 = vperm.xlu1 %2082, %v861_v53   ;;  %894 = vperm.xlu0 %2081, %v860_v54  }
 0x10f   : > { %909 = vperm.xlu1 %2082, %v863_v55   ;;  %904 = vperm.xlu0 %2081, %v862_v56   ;;  %v843_v55 = vld [vmem:[%s2762_s20 + $0x18] sm:$0xff]  ;;  %v842_v56 = vld [vmem:[%s2762_s20 + $0x10] sm:$0xff] }
 0x113   : > { %919 = vperm.xlu1 %2082, %v865_v57   ;;  %914 = vperm.xlu0 %2081, %v864_v58  }
 0x117   : > { %929 = vperm.xlu1 %2082, %v867_v59   ;;  %924 = vperm.xlu0 %2081, %v866_v60  }
 0x11b   : > { %939 = vperm.xlu1 %2082, %v869_v61   ;;  %934 = vperm.xlu0 %2081, %v868_v62   ;;  %v845_v61 = vld [vmem:[%s2762_s20 + $0x28] sm:$0xff]  ;;  %v844_v62 = vld [vmem:[%s2762_s20 + $0x20] sm:$0xff] }
 0x11f   : > { %949 = vperm.xlu1 %2082, %v871_v63   ;;  %944 = vperm.xlu0 %2081, %v870_v0  }
 0x162   : > { %v740_v3 = vpop.permute.xlu1 %739  ;;  %v730_v4 = vpop.permute.xlu0 %729 }
 0x163   : > { %v809_v5 = vmul.f32 %v740_v3, %v697_v1  ;;  %v807_v6 = vmul.f32 %v730_v4, %v695_v2  ;;  %v847_v3 = vld [vmem:[%s2762_s20 + $0x38] sm:$0xff]  ;;  %v846_v4 = vld [vmem:[%s2762_s20 + $0x30] sm:$0xff] }
 0x165   : > { %825 = vst [vmem:[#allocation6 + $0x10] sm:$0xff] %v809_v5  ;;  %823 = vst [vmem:[#allocation6] sm:$0xff] %v807_v6 }
 0x166   : > { %v745_v9 = vpop.permute.xlu1 %744  ;;  %v735_v10 = vpop.permute.xlu0 %734 }
 0x167   : > { %v810_v11 = vmul.f32 %v745_v9, %v698_v7  ;;  %v808_v12 = vmul.f32 %v735_v10, %v696_v8  ;;  %v849_v9 = vld [vmem:[%s2762_s20 + $0x48] sm:$0xff]  ;;  %v848_v10 = vld [vmem:[%s2762_s20 + $0x40] sm:$0xff] }
 0x169   : > { %826 = vst [vmem:[#allocation6 + $0x18] sm:$0xff] %v810_v11  ;;  %824 = vst [vmem:[#allocation6 + $0x8] sm:$0xff] %v808_v12 }
 0x16a   : > { %v755_v15 = vpop.permute.xlu1 %754  ;;  %v750_v16 = vpop.permute.xlu0 %749 }
 0x16b   : > { %v812_v17 = vmul.f32 %v755_v15, %v700_v13  ;;  %v811_v18 = vmul.f32 %v750_v16, %v699_v14  ;;  %v851_v15 = vld [vmem:[%s2762_s20 + $0x58] sm:$0xff]  ;;  %v850_v16 = vld [vmem:[%s2762_s20 + $0x50] sm:$0xff] }
 0x16d   : > { %828 = vst [vmem:[#allocation6 + $0x28] sm:$0xff] %v812_v17  ;;  %827 = vst [vmem:[#allocation6 + $0x20] sm:$0xff] %v811_v18 }
 0x16e   : > { %v765_v21 = vpop.permute.xlu1 %764  ;;  %v760_v22 = vpop.permute.xlu0 %759 }
 0x16f   : > { %v814_v23 = vmul.f32 %v765_v21, %v702_v19  ;;  %v813_v24 = vmul.f32 %v760_v22, %v701_v20  ;;  %v853_v21 = vld [vmem:[%s2762_s20 + $0x68] sm:$0xff]  ;;  %v852_v22 = vld [vmem:[%s2762_s20 + $0x60] sm:$0xff] }
 0x171   : > { %830 = vst [vmem:[#allocation6 + $0x38] sm:$0xff] %v814_v23  ;;  %829 = vst [vmem:[#allocation6 + $0x30] sm:$0xff] %v813_v24 }
 0x172   : > { %v775_v27 = vpop.permute.xlu1 %774  ;;  %v770_v28 = vpop.permute.xlu0 %769 }
 0x173   : > { %v816_v29 = vmul.f32 %v775_v27, %v704_v25  ;;  %v815_v30 = vmul.f32 %v770_v28, %v703_v26  ;;  %v855_v27 = vld [vmem:[%s2762_s20 + $0x78] sm:$0xff]  ;;  %v854_v28 = vld [vmem:[%s2762_s20 + $0x70] sm:$0xff] }
 0x175   : > { %832 = vst [vmem:[#allocation6 + $0x48] sm:$0xff] %v816_v29  ;;  %831 = vst [vmem:[#allocation6 + $0x40] sm:$0xff] %v815_v30 }
 0x176   : > { %v785_v33 = vpop.permute.xlu1 %784  ;;  %v780_v34 = vpop.permute.xlu0 %779 }
 0x177   : > { %v818_v35 = vmul.f32 %v785_v33, %v706_v31  ;;  %v817_v36 = vmul.f32 %v780_v34, %v705_v32 }
 0x179   : > { %834 = vst [vmem:[#allocation6 + $0x58] sm:$0xff] %v818_v35  ;;  %833 = vst [vmem:[#allocation6 + $0x50] sm:$0xff] %v817_v36 }
 0x17a   : > { %v795_v39 = vpop.permute.xlu1 %794  ;;  %v790_v40 = vpop.permute.xlu0 %789 }
 0x17b   : > { %v820_v41 = vmul.f32 %v795_v39, %v708_v37  ;;  %v819_v42 = vmul.f32 %v790_v40, %v707_v38 }
 0x17d   : > { %836 = vst [vmem:[#allocation6 + $0x68] sm:$0xff] %v820_v41  ;;  %835 = vst [vmem:[#allocation6 + $0x60] sm:$0xff] %v819_v42 }
 0x17e   : > { %v805_v45 = vpop.permute.xlu1 %804  ;;  %v800_v46 = vpop.permute.xlu0 %799 }
 0x17f   : > { %v822_v47 = vmul.f32 %v805_v45, %v710_v43  ;;  %v821_v48 = vmul.f32 %v800_v46, %v709_v44 }
 0x181   : > { %838 = vst [vmem:[#allocation6 + $0x78] sm:$0xff] %v822_v47  ;;  %837 = vst [vmem:[#allocation6 + $0x70] sm:$0xff] %v821_v48 }
 0x182   : > { %v880_v51 = vpop.permute.xlu1 %879  ;;  %v875_v52 = vpop.permute.xlu0 %874 }
 0x183   : > { %v953_v53 = vmul.f32 %v880_v51, %v841_v49  ;;  %v952_v54 = vmul.f32 %v875_v52, %v840_v50 }
 0x185   : > { %969 = vst [vmem:[#allocation7 + $0x8] sm:$0xff] %v953_v53  ;;  %968 = vst [vmem:[#allocation7] sm:$0xff] %v952_v54 }
 0x186   : > { %v890_v57 = vpop.permute.xlu1 %889  ;;  %v885_v58 = vpop.permute.xlu0 %884 }
 0x187   : > { %v955_v59 = vmul.f32 %v890_v57, %v843_v55  ;;  %v954_v60 = vmul.f32 %v885_v58, %v842_v56 }
 0x189   : > { %971 = vst [vmem:[#allocation7 + $0x18] sm:$0xff] %v955_v59  ;;  %970 = vst [vmem:[#allocation7 + $0x10] sm:$0xff] %v954_v60 }
 0x18a   : > { %v900_v63 = vpop.permute.xlu1 %899  ;;  %v895_v0 = vpop.permute.xlu0 %894 }
 0x18b   : > { %v957_v1 = vmul.f32 %v900_v63, %v845_v61  ;;  %v956_v2 = vmul.f32 %v895_v0, %v844_v62 }
 0x18d   : > { %973 = vst [vmem:[#allocation7 + $0x28] sm:$0xff] %v957_v1  ;;  %972 = vst [vmem:[#allocation7 + $0x20] sm:$0xff] %v956_v2 }
 0x18e   : > { %v910_v5 = vpop.permute.xlu1 %909  ;;  %v905_v6 = vpop.permute.xlu0 %904 }
 0x18f   : > { %v959_v7 = vmul.f32 %v910_v5, %v847_v3  ;;  %v958_v8 = vmul.f32 %v905_v6, %v846_v4 }
 0x191   : > { %975 = vst [vmem:[#allocation7 + $0x38] sm:$0xff] %v959_v7  ;;  %974 = vst [vmem:[#allocation7 + $0x30] sm:$0xff] %v958_v8 }
 0x192   : > { %v920_v11 = vpop.permute.xlu1 %919  ;;  %v915_v12 = vpop.permute.xlu0 %914 }
 0x193   : > { %v961_v13 = vmul.f32 %v920_v11, %v849_v9  ;;  %v960_v14 = vmul.f32 %v915_v12, %v848_v10 }
 0x195   : > { %977 = vst [vmem:[#allocation7 + $0x48] sm:$0xff] %v961_v13  ;;  %976 = vst [vmem:[#allocation7 + $0x40] sm:$0xff] %v960_v14 }
 0x196   : > { %v930_v17 = vpop.permute.xlu1 %929  ;;  %v925_v18 = vpop.permute.xlu0 %924 }
 0x197   : > { %v963_v19 = vmul.f32 %v930_v17, %v851_v15  ;;  %v962_v20 = vmul.f32 %v925_v18, %v850_v16 }
 0x199   : > { %979 = vst [vmem:[#allocation7 + $0x58] sm:$0xff] %v963_v19  ;;  %978 = vst [vmem:[#allocation7 + $0x50] sm:$0xff] %v962_v20 }
 0x19a   : > { %v940_v23 = vpop.permute.xlu1 %939  ;;  %v935_v24 = vpop.permute.xlu0 %934 }
 0x19b   : > { %v965_v25 = vmul.f32 %v940_v23, %v853_v21  ;;  %v964_v26 = vmul.f32 %v935_v24, %v852_v22 }
 0x19d   : > { %981 = vst [vmem:[#allocation7 + $0x68] sm:$0xff] %v965_v25  ;;  %980 = vst [vmem:[#allocation7 + $0x60] sm:$0xff] %v964_v26 }
 0x19e   : > { %v950_v29 = vpop.permute.xlu1 %949  ;;  %v945_v30 = vpop.permute.xlu0 %944 }
 0x19f   : > { %v967_v31 = vmul.f32 %v950_v29, %v855_v27  ;;  %v966_v32 = vmul.f32 %v945_v30, %v854_v28 }
 0x1a1   : > { %983 = vst [vmem:[#allocation7 + $0x78] sm:$0xff] %v967_v31  ;;  %982 = vst [vmem:[#allocation7 + $0x70] sm:$0xff] %v966_v32 }
 0x1a2 PF: > { %s3070_s5 = sshll.u32 %s2337_s30, 7  ;;  %v2083_v33 = vld [vmem:[%s2602_s7] sm:$0xff]   ;;  %v2085_v51 = vld [vmem:[%s2602_s7 + $0x8] sm:$0xff]   ;;  %v2087_v53 = vld [vmem:[%s2602_s7 + $0x10] sm:$0xff]   ;;  %p1836_p4 = scmp.ne.s32.totalorder %s2337_s30, 2 }
 0x1a3   : > { %s1016_s15 = sshra.s32 %s3070_s5, 4  ;;  %v2084_v34 = vld [vmem:[%s2604_s22] sm:$0xff]   ;;  %1897 = vmatprep.mubr.bf16.mxu0 %v2083_v33  ;;  %v2086_v52 = vld [vmem:[%s2604_s22 + $0x8] sm:$0xff]   ;;  %v2088_v54 = vld [vmem:[%s2604_s22 + $0x10] sm:$0xff]   ;;  %s2820_s30 = scalar_lea.vmem (!%p1836_p4), [#allocation2], %s2616_s18 }
 0x1a4   : > { %s1818_s19 = sshll.u32 %s1016_s15, 3  ;;  %1929 = vmatprep.mubr.bf16.mxu1 %v2084_v34  ;;  %v2089_v55 = vld [vmem:[%s2602_s7 + $0x18] sm:$0xff]   ;;  %v2091_v57 = vld [vmem:[%s2602_s7 + $0x20] sm:$0xff]   ;;  %v2093_v59 = vld [vmem:[%s2602_s7 + $0x28] sm:$0xff]  }
 0x1a5   : > { %s2784_s16 = scalar_lea.vmem [#allocation5], %s1818_s19  ;;  %s2787_s23 = scalar_lea.vmem [#allocation4], %s1818_s19  ;;  %v2090_v56 = vld [vmem:[%s2604_s22 + $0x18] sm:$0xff]   ;;  %v2092_v58 = vld [vmem:[%s2604_s22 + $0x20] sm:$0xff]   ;;  %v2094_v60 = vld [vmem:[%s2604_s22 + $0x28] sm:$0xff]  }
 0x1a6   : > { %v1020_v35 = vld [vmem:[%s2784_s16] sm:$0xff]  ;;  %v1021_v37 = vld [vmem:[%s2784_s16 + $0x8] sm:$0xff]  ;;  %v1022_v39 = vld [vmem:[%s2784_s16 + $0x10] sm:$0xff] }
 0x1a7   : > { %v1239_v36 = vld [vmem:[%s2787_s23] sm:$0xff]  ;;  %1881 = vmatprep.subr.bf16.mxu0 %v1020_v35  ;;  %v1240_v38 = vld [vmem:[%s2787_s23 + $0x8] sm:$0xff]  ;;  %v1241_v40 = vld [vmem:[%s2787_s23 + $0x10] sm:$0xff] }
 0x1a8   : > { %1913 = vmatprep.subr.bf16.mxu1 %v1239_v36  ;;  %1882 = vmatpush3.bf16.msra.mxu0 %v1020_v35  ;;  %v1023_v41 = vld [vmem:[%s2784_s16 + $0x18] sm:$0xff]  ;;  %v1024_v43 = vld [vmem:[%s2784_s16 + $0x20] sm:$0xff]  ;;  %v1025_v45 = vld [vmem:[%s2784_s16 + $0x28] sm:$0xff] }
 0x1a9   : > { %1914 = vmatpush3.bf16.msra.mxu1 %v1239_v36  ;;  %1883 = vmatprep.subr.bf16.mxu0 %v1021_v37  ;;  %v1242_v42 = vld [vmem:[%s2787_s23 + $0x18] sm:$0xff]  ;;  %v1243_v44 = vld [vmem:[%s2787_s23 + $0x20] sm:$0xff]  ;;  %v1244_v46 = vld [vmem:[%s2787_s23 + $0x28] sm:$0xff] }
 0x1aa   : > { %1915 = vmatprep.subr.bf16.mxu1 %v1240_v38  ;;  %v1026_v47 = vld [vmem:[%s2784_s16 + $0x30] sm:$0xff]  ;;  %v1027_v49 = vld [vmem:[%s2784_s16 + $0x38] sm:$0xff]  ;;  %v984_v3 = vld [vmem:[#allocation6] sm:$0xff] }
 0x1ab   : > { %v1245_v48 = vld [vmem:[%s2787_s23 + $0x30] sm:$0xff]  ;;  %v1246_v50 = vld [vmem:[%s2787_s23 + $0x38] sm:$0xff]  ;;  %v1205_v4 = vld [vmem:[#allocation7] sm:$0xff] }
 0x1ac   : > { %1884 = vmatpush3.bf16.msra.mxu0 %v1021_v37  ;;  %v2095_v61 = vld [vmem:[%s2602_s7 + $0x30] sm:$0xff]   ;;  %v2097_v63 = vld [vmem:[%s2602_s7 + $0x38] sm:$0xff]   ;;  %v985_v13 = vld [vmem:[#allocation6 + $0x8] sm:$0xff]  ;;  %s2855_s7 = scalar_lea.vmem (!%p1836_p4), [#allocation3], %s2616_s18 }
 0x1ad   : > { %1916 = vmatpush3.bf16.msra.mxu1 %v1240_v38  ;;  %1885 = vmatprep.subr.bf16.mxu0 %v1022_v39  ;;  %v2096_v62 = vld [vmem:[%s2604_s22 + $0x30] sm:$0xff]   ;;  %v2098_v0 = vld [vmem:[%s2604_s22 + $0x38] sm:$0xff]   ;;  %v1206_v14 = vld [vmem:[#allocation7 + $0x8] sm:$0xff] }
 0x1ae   : > { %1917 = vmatprep.subr.bf16.mxu1 %v1241_v40  ;;  %v986_v1 = vld [vmem:[#allocation6 + $0x10] sm:$0xff]  ;;  %v987_v7 = vld [vmem:[#allocation6 + $0x18] sm:$0xff]  ;;  %v988_v27 = vld [vmem:[#allocation6 + $0x20] sm:$0xff] }
 0x1af   : > { %v1207_v2 = vld [vmem:[#allocation7 + $0x10] sm:$0xff]  ;;  %v1208_v8 = vld [vmem:[#allocation7 + $0x18] sm:$0xff]  ;;  %v1209_v28 = vld [vmem:[#allocation7 + $0x20] sm:$0xff] }
 0x1b0   : > { %1886 = vmatpush3.bf16.msra.mxu0 %v1022_v39  ;;  %v990_v25 = vld [vmem:[#allocation6 + $0x30] sm:$0xff]  ;;  %v991_v31 = vld [vmem:[#allocation6 + $0x38] sm:$0xff]  ;;  %v989_v37 = vld [vmem:[#allocation6 + $0x28] sm:$0xff] }
 0x1b1   : > { %1918 = vmatpush3.bf16.msra.mxu1 %v1241_v40  ;;  %1887 = vmatprep.subr.bf16.mxu0 %v1023_v41  ;;  %v1211_v26 = vld [vmem:[#allocation7 + $0x30] sm:$0xff]  ;;  %v1212_v32 = vld [vmem:[#allocation7 + $0x38] sm:$0xff]  ;;  %v1210_v38 = vld [vmem:[#allocation7 + $0x28] sm:$0xff] }
 0x1b2   : > { %1919 = vmatprep.subr.bf16.mxu1 %v1242_v42 }
 0x1b4   : > { %1888 = vmatpush3.bf16.msra.mxu0 %v1023_v41 }
 0x1b5   : > { %1920 = vmatpush3.bf16.msra.mxu1 %v1242_v42  ;;  %1889 = vmatprep.subr.bf16.mxu0 %v1024_v43 }
 0x1b6   : > { %1921 = vmatprep.subr.bf16.mxu1 %v1243_v44 }
 0x1b8   : > { %1890 = vmatpush3.bf16.msra.mxu0 %v1024_v43 }
 0x1b9   : > { %1922 = vmatpush3.bf16.msra.mxu1 %v1243_v44  ;;  %1891 = vmatprep.subr.bf16.mxu0 %v1025_v45 }
 0x1ba   : > { %1923 = vmatprep.subr.bf16.mxu1 %v1244_v46 }
 0x1bc   : > { %1892 = vmatpush3.bf16.msra.mxu0 %v1025_v45 }
 0x1bd   : > { %1924 = vmatpush3.bf16.msra.mxu1 %v1244_v46  ;;  %1893 = vmatprep.subr.bf16.mxu0 %v1026_v47 }
 0x1be   : > { %1925 = vmatprep.subr.bf16.mxu1 %v1245_v48 }
 0x1c0   : > { %1894 = vmatpush3.bf16.msra.mxu0 %v1026_v47 }
 0x1c1   : > { %1926 = vmatpush3.bf16.msra.mxu1 %v1245_v48  ;;  %1895 = vmatprep.subr.bf16.mxu0 %v1027_v49 }
 0x1c2   : > { %1927 = vmatprep.subr.bf16.mxu1 %v1246_v50 }
 0x1c4   : > { %1896 = vmatpush3.bf16.msra.mxu0 %v1027_v49  ;;  %v994_v49 = vld [vmem:[#allocation6 + $0x50] sm:$0xff] }
 0x1c5   : > { %1928 = vmatpush3.bf16.msra.mxu1 %v1246_v50  ;;  %v1215_v50 = vld [vmem:[#allocation7 + $0x50] sm:$0xff] }
 0x1c7   : > { %1898 = vmatmul.mubr.bf16.vlgmr.msra.gmra.mrb[0].mxu0 %v2085_v51  ;;  %v992_v51 = vld [vmem:[#allocation6 + $0x40] sm:$0xff] }
 0x1c8   : > { %1930 = vmatmul.mubr.bf16.vlgmr.msra.gmra.mrb[0].mxu1 %v2086_v52  ;;  %1901 = vmatprep.mubr.bf16.mxu0 %v2087_v53  ;;  %v1213_v52 = vld [vmem:[#allocation7 + $0x40] sm:$0xff] }
 0x1c9   : > { %1933 = vmatprep.mubr.bf16.mxu1 %v2088_v54 }
 0x1cf   : > { %1902 = vmatmul.mubr.bf16.gmra.mrb[4].mxu0 %v2089_v55  ;;  %v995_v55 = vld [vmem:[#allocation6 + $0x58] sm:$0xff] }
 0x1d0   : > { %1934 = vmatmul.mubr.bf16.gmra.mrb[4].mxu1 %v2090_v56  ;;  %1905 = vmatprep.mubr.bf16.mxu0 %v2091_v57  ;;  %v1216_v56 = vld [vmem:[#allocation7 + $0x58] sm:$0xff] }
 0x1d1   : > { %1937 = vmatprep.mubr.bf16.mxu1 %v2092_v58 }
 0x1d7   : > { %1906 = vmatmul.mubr.bf16.gmra.mrb[8].mxu0 %v2093_v59 }
 0x1d8   : > { %1938 = vmatmul.mubr.bf16.gmra.mrb[8].mxu1 %v2094_v60  ;;  %1909 = vmatprep.mubr.bf16.mxu0 %v2095_v61  ;;  %v993_v61 = vld [vmem:[#allocation6 + $0x48] sm:$0xff] }
 0x1d9   : > { %1941 = vmatprep.mubr.bf16.mxu1 %v2096_v62  ;;  %v1214_v62 = vld [vmem:[#allocation7 + $0x48] sm:$0xff] }
 0x1df   : > { %1910 = vmatmul.mubr.bf16.gmra.mrb[12].mxu0 %v2097_v63 }
 0x1e0   : > { %1942 = vmatmul.mubr.bf16.gmra.mrb[12].mxu1 %v2098_v0 }
 0x29a   : > { %v1899_v5 = vpop.f32.mrb[0].mxu0 }
 0x29b   : > { %v1931_v6 = vpop.f32.mrb[0].mxu1  ;;  %v1175_v9 = vadd.f32 %v1899_v5, %v986_v1  ;;  %v1110_v11 = vpop.f32.mrb[1].mxu0 }
 0x29c   : > { %v1394_v10 = vadd.f32 %v1931_v6, %v1207_v2  ;;  %v1329_v12 = vpop.f32.mrb[1].mxu1  ;;  %v1173_v15 = vadd.f32 %v1110_v11, %v984_v3  ;;  %v1900_v17 = vpop.f32.mrb[2].mxu0  ;;  %v996_v11 = vld [vmem:[#allocation6 + $0x60] sm:$0xff] }
 0x29d   : > { %v1392_v16 = vadd.f32 %v1329_v12, %v1205_v4  ;;  %v1932_v18 = vpop.f32.mrb[2].mxu1  ;;  %1191 = vst [vmem:[#allocation6 + $0x10] sm:$0xff] %v1175_v9  ;;  %v1176_v19 = vadd.f32 %v1900_v17, %v987_v7  ;;  %v1113_v21 = vpop.f32.mrb[3].mxu0  ;;  %v998_v9 = vld [vmem:[#allocation6 + $0x70] sm:$0xff]  ;;  %v1217_v12 = vld [vmem:[#allocation7 + $0x60] sm:$0xff] }
 0x29e   : > { %1410 = vst [vmem:[#allocation7 + $0x10] sm:$0xff] %v1394_v10  ;;  %v1395_v20 = vadd.f32 %v1932_v18, %v1208_v8  ;;  %v1332_v22 = vpop.f32.mrb[3].mxu1  ;;  %1189 = vst [vmem:[#allocation6] sm:$0xff] %v1173_v15  ;;  %v1174_v23 = vadd.f32 %v1113_v21, %v985_v13  ;;  %v1219_v10 = vld [vmem:[#allocation7 + $0x70] sm:$0xff]  ;;  %v999_v15 = vld [vmem:[#allocation6 + $0x78] sm:$0xff] }
 0x29f   : > { %1408 = vst [vmem:[#allocation7] sm:$0xff] %v1392_v16  ;;  %v1393_v24 = vadd.f32 %v1332_v22, %v1206_v14  ;;  %1192 = vst [vmem:[#allocation6 + $0x18] sm:$0xff] %v1176_v19  ;;  %v1220_v16 = vld [vmem:[#allocation7 + $0x78] sm:$0xff]  ;;  %v997_v21 = vld [vmem:[#allocation6 + $0x68] sm:$0xff] }
 0x2a0   : > { %1411 = vst [vmem:[#allocation7 + $0x18] sm:$0xff] %v1395_v20  ;;  %1190 = vst [vmem:[#allocation6 + $0x8] sm:$0xff] %v1174_v23  ;;  %v1218_v22 = vld [vmem:[#allocation7 + $0x68] sm:$0xff] }
 0x2a1   : > { %1409 = vst [vmem:[#allocation7 + $0x8] sm:$0xff] %v1393_v24 }
 0x2a2   : > { %v1903_v29 = vpop.f32.mrb[4].mxu0 }
 0x2a3   : > { %v1935_v30 = vpop.f32.mrb[4].mxu1  ;;  %v1179_v33 = vadd.f32 %v1903_v29, %v990_v25  ;;  %v1126_v35 = vpop.f32.mrb[5].mxu0 }
 0x2a4   : > { %v1398_v34 = vadd.f32 %v1935_v30, %v1211_v26  ;;  %v1345_v36 = vpop.f32.mrb[5].mxu1  ;;  %v1177_v39 = vadd.f32 %v1126_v35, %v988_v27  ;;  %v1904_v41 = vpop.f32.mrb[6].mxu0  ;;  %v1430_v35 = vld [vmem:[#allocation6 + $0x10] sm:$0xff] (!%p1836_p4) }
 0x2a5   : > { %v1396_v40 = vadd.f32 %v1345_v36, %v1209_v28  ;;  %v1936_v42 = vpop.f32.mrb[6].mxu1  ;;  %1195 = vst [vmem:[#allocation6 + $0x30] sm:$0xff] %v1179_v33  ;;  %v1180_v43 = vadd.f32 %v1904_v41, %v991_v31  ;;  %v1129_v45 = vpop.f32.mrb[7].mxu0  ;;  %v1428_v33 = vld [vmem:[#allocation6] sm:$0xff] (!%p1836_p4) }
 0x2a6   : > { %1414 = vst [vmem:[#allocation7 + $0x30] sm:$0xff] %v1398_v34  ;;  %v1399_v44 = vadd.f32 %v1936_v42, %v1212_v32  ;;  %v1348_v46 = vpop.f32.mrb[7].mxu1  ;;  %1193 = vst [vmem:[#allocation6 + $0x20] sm:$0xff] %v1177_v39  ;;  %v1178_v47 = vadd.f32 %v1129_v45, %v989_v37  ;;  %v1444_v36 = vmax.f32 (!%p1836_p4), %v1428_v33, 0.0  ;;  %v1431_v39 = vld [vmem:[#allocation6 + $0x18] sm:$0xff] (!%p1836_p4) }
 0x2a7   : > { %1412 = vst [vmem:[#allocation7 + $0x20] sm:$0xff] %v1396_v40  ;;  %v1397_v48 = vadd.f32 %v1348_v46, %v1210_v38  ;;  %1196 = vst [vmem:[#allocation6 + $0x38] sm:$0xff] %v1180_v43  ;;  %v1429_v34 = vld [vmem:[#allocation6 + $0x8] sm:$0xff] (!%p1836_p4)  ;;  %v1446_v38 = vmax.f32 (!%p1836_p4), %v1430_v35, 0.0  ;;  %v1447_v42 = vmax.f32 (!%p1836_p4), %v1431_v39, 0.0 }
 0x2a8   : > { %1415 = vst [vmem:[#allocation7 + $0x38] sm:$0xff] %v1399_v44  ;;  %1194 = vst [vmem:[#allocation6 + $0x28] sm:$0xff] %v1178_v47  ;;  %v1445_v37 = vmax.f32 (!%p1836_p4), %v1429_v34, 0.0 }
 0x2a9   : > { %1413 = vst [vmem:[#allocation7 + $0x28] sm:$0xff] %v1397_v48  ;;  %1493 = vst [vmem:[%s2820_s30] sm:$0xff] (!%p1836_p4), %v1444_v36 }
 0x2aa   : > { %v1907_v53 = vpop.f32.mrb[8].mxu0  ;;  %1526 = vst [vmem:[%s2693_s3] sm:$0xff] (!%p1836_p4), %v1444_v36  ;;  %1494 = vst [vmem:[%s2820_s30 + $0x8] sm:$0xff] (!%p1836_p4), %v1445_v37 }
 0x2ab   : > { %v1939_v54 = vpop.f32.mrb[8].mxu1  ;;  %v1183_v57 = vadd.f32 %v1907_v53, %v994_v49  ;;  %v1142_v59 = vpop.f32.mrb[9].mxu0  ;;  %1527 = vst [vmem:[%s2693_s3 + $0x8] sm:$0xff] (!%p1836_p4), %v1445_v37  ;;  %1495 = vst [vmem:[%s2820_s30 + $0x10] sm:$0xff] (!%p1836_p4), %v1446_v38 }
 0x2ac   : > { %v1402_v58 = vadd.f32 %v1939_v54, %v1215_v50  ;;  %v1361_v60 = vpop.f32.mrb[9].mxu1  ;;  %v1181_v63 = vadd.f32 %v1142_v59, %v992_v51  ;;  %v1908_v1 = vpop.f32.mrb[10].mxu0  ;;  %v1434_v45 = vld [vmem:[#allocation6 + $0x30] sm:$0xff] (!%p1836_p4)  ;;  %1528 = vst [vmem:[%s2693_s3 + $0x10] sm:$0xff] (!%p1836_p4), %v1446_v38  ;;  %1496 = vst [vmem:[%s2820_s30 + $0x18] sm:$0xff] (!%p1836_p4), %v1447_v42 }
 0x2ad   : > { %v1400_v0 = vadd.f32 %v1361_v60, %v1213_v52  ;;  %v1940_v2 = vpop.f32.mrb[10].mxu1  ;;  %1199 = vst [vmem:[#allocation6 + $0x50] sm:$0xff] %v1183_v57  ;;  %v1184_v3 = vadd.f32 %v1908_v1, %v995_v55  ;;  %v1145_v5 = vpop.f32.mrb[11].mxu0  ;;  %v1432_v40 = vld [vmem:[#allocation6 + $0x20] sm:$0xff] (!%p1836_p4)  ;;  %v1450_v48 = vmax.f32 (!%p1836_p4), %v1434_v45, 0.0  ;;  %1529 = vst [vmem:[%s2693_s3 + $0x18] sm:$0xff] (!%p1836_p4), %v1447_v42 }
 0x2ae   : > { %1418 = vst [vmem:[#allocation7 + $0x50] sm:$0xff] %v1402_v58  ;;  %v1403_v4 = vadd.f32 %v1940_v2, %v1216_v56  ;;  %v1364_v6 = vpop.f32.mrb[11].mxu1  ;;  %1197 = vst [vmem:[#allocation6 + $0x40] sm:$0xff] %v1181_v63  ;;  %v1182_v7 = vadd.f32 %v1145_v5, %v993_v61  ;;  %v1448_v43 = vmax.f32 (!%p1836_p4), %v1432_v40, 0.0  ;;  %v1435_v46 = vld [vmem:[#allocation6 + $0x38] sm:$0xff] (!%p1836_p4)  ;;  %v1461_v1 = vld [vmem:[#allocation7 + $0x8] sm:$0xff] (!%p1836_p4) }
 0x2af   : > { %1416 = vst [vmem:[#allocation7 + $0x40] sm:$0xff] %v1400_v0  ;;  %v1401_v8 = vadd.f32 %v1364_v6, %v1214_v62  ;;  %1200 = vst [vmem:[#allocation6 + $0x58] sm:$0xff] %v1184_v3  ;;  %v1433_v41 = vld [vmem:[#allocation6 + $0x28] sm:$0xff] (!%p1836_p4)  ;;  %v1451_v49 = vmax.f32 (!%p1836_p4), %v1435_v46, 0.0  ;;  %v1460_v0 = vld [vmem:[#allocation7] sm:$0xff] (!%p1836_p4) }
 0x2b0   : > { %1419 = vst [vmem:[#allocation7 + $0x58] sm:$0xff] %v1403_v4  ;;  %1198 = vst [vmem:[#allocation6 + $0x48] sm:$0xff] %v1182_v7  ;;  %v1449_v44 = vmax.f32 (!%p1836_p4), %v1433_v41, 0.0  ;;  %v1476_v3 = vmax.f32 (!%p1836_p4), %v1460_v0, 0.0  ;;  %v1477_v4 = vmax.f32 (!%p1836_p4), %v1461_v1, 0.0  ;;  %v1462_v5 = vld [vmem:[#allocation7 + $0x10] sm:$0xff] (!%p1836_p4) }
 0x2b1   : > { %1417 = vst [vmem:[#allocation7 + $0x48] sm:$0xff] %v1401_v8  ;;  %1497 = vst [vmem:[%s2820_s30 + $0x20] sm:$0xff] (!%p1836_p4), %v1448_v43  ;;  %v1463_v6 = vld [vmem:[#allocation7 + $0x18] sm:$0xff] (!%p1836_p4)  ;;  %v1464_v7 = vld [vmem:[#allocation7 + $0x20] sm:$0xff] (!%p1836_p4)  ;;  %v1478_v8 = vmax.f32 (!%p1836_p4), %v1462_v5, 0.0 }
 0x2b2   : > { %v1911_v13 = vpop.f32.mrb[12].mxu0  ;;  %1530 = vst [vmem:[%s2693_s3 + $0x20] sm:$0xff] (!%p1836_p4), %v1448_v43  ;;  %1498 = vst [vmem:[%s2820_s30 + $0x28] sm:$0xff] (!%p1836_p4), %v1449_v44 }
 0x2b3   : > { %v1943_v14 = vpop.f32.mrb[12].mxu1  ;;  %v1187_v17 = vadd.f32 %v1911_v13, %v998_v9  ;;  %v1158_v19 = vpop.f32.mrb[13].mxu0  ;;  %1427 = sbr.rel (%p1836_p4) target bundleno = 722 (0x2d2), region = 105  ;;  %1531 = vst [vmem:[%s2693_s3 + $0x28] sm:$0xff] (!%p1836_p4), %v1449_v44  ;;  %1499 = vst [vmem:[%s2820_s30 + $0x30] sm:$0xff] (!%p1836_p4), %v1450_v48  ;;  %v1479_v9 = vmax.f32 (!%p1836_p4), %v1463_v6, 0.0 }
 0x2b4   : > { %v1406_v18 = vadd.f32 %v1943_v14, %v1219_v10  ;;  %v1377_v20 = vpop.f32.mrb[13].mxu1  ;;  %v1185_v23 = vadd.f32 %v1158_v19, %v996_v11  ;;  %v1912_v25 = vpop.f32.mrb[14].mxu0  ;;  %v1438_v52 = vld [vmem:[#allocation6 + $0x50] sm:$0xff] (!%p1836_p4)  ;;  %1532 = vst [vmem:[%s2693_s3 + $0x30] sm:$0xff] (!%p1836_p4), %v1450_v48  ;;  %1500 = vst [vmem:[%s2820_s30 + $0x38] sm:$0xff] (!%p1836_p4), %v1451_v49  ;;  %v1480_v10 = vmax.f32 (!%p1836_p4), %v1464_v7, 0.0 }
 0x2b5   : > { %v1404_v24 = vadd.f32 %v1377_v20, %v1217_v12  ;;  %v1944_v26 = vpop.f32.mrb[14].mxu1  ;;  %1203 = vst [vmem:[#allocation6 + $0x70] sm:$0xff] %v1187_v17  ;;  %v1188_v27 = vadd.f32 %v1912_v25, %v999_v15  ;;  %v1161_v29 = vpop.f32.mrb[15].mxu0  ;;  %v1436_v47 = vld [vmem:[#allocation6 + $0x40] sm:$0xff] (!%p1836_p4)  ;;  %v1454_v55 = vmax.f32 (!%p1836_p4), %v1438_v52, 0.0  ;;  %1533 = vst [vmem:[%s2693_s3 + $0x38] sm:$0xff] (!%p1836_p4), %v1451_v49 }
 0x2b6   : > { %1422 = vst [vmem:[#allocation7 + $0x70] sm:$0xff] %v1406_v18  ;;  %v1407_v28 = vadd.f32 %v1944_v26, %v1220_v16  ;;  %v1380_v30 = vpop.f32.mrb[15].mxu1  ;;  %1201 = vst [vmem:[#allocation6 + $0x60] sm:$0xff] %v1185_v23  ;;  %v1186_v31 = vadd.f32 %v1161_v29, %v997_v21  ;;  %v1452_v50 = vmax.f32 (!%p1836_p4), %v1436_v47, 0.0  ;;  %v1439_v53 = vld [vmem:[#allocation6 + $0x58] sm:$0xff] (!%p1836_p4)  ;;  %v1465_v11 = vld [vmem:[#allocation7 + $0x28] sm:$0xff] (!%p1836_p4) }
 0x2b7   : > { %1420 = vst [vmem:[#allocation7 + $0x60] sm:$0xff] %v1404_v24  ;;  %v1405_v32 = vadd.f32 %v1380_v30, %v1218_v22  ;;  %1204 = vst [vmem:[#allocation6 + $0x78] sm:$0xff] %v1188_v27  ;;  %v1437_v51 = vld [vmem:[#allocation6 + $0x48] sm:$0xff] (!%p1836_p4)  ;;  %v1455_v56 = vmax.f32 (!%p1836_p4), %v1439_v53, 0.0  ;;  %v1466_v12 = vld [vmem:[#allocation7 + $0x30] sm:$0xff] (!%p1836_p4)  ;;  %v1481_v14 = vmax.f32 (!%p1836_p4), %v1465_v11, 0.0 }
 0x2b8   : > { %1423 = vst [vmem:[#allocation7 + $0x78] sm:$0xff] %v1407_v28  ;;  %1202 = vst [vmem:[#allocation6 + $0x68] sm:$0xff] %v1186_v31  ;;  %v1453_v54 = vmax.f32 (!%p1836_p4), %v1437_v51, 0.0  ;;  %v1467_v13 = vld [vmem:[#allocation7 + $0x38] sm:$0xff] (!%p1836_p4)  ;;  %v1482_v15 = vmax.f32 (!%p1836_p4), %v1466_v12, 0.0  ;;  %v1468_v17 = vld [vmem:[#allocation7 + $0x40] sm:$0xff] (!%p1836_p4) }
 0x2b9   : > { %1421 = vst [vmem:[#allocation7 + $0x68] sm:$0xff] %v1405_v32  ;;  %1501 = vst [vmem:[%s2820_s30 + $0x40] sm:$0xff] (!%p1836_p4), %v1452_v50  ;;  %v1483_v16 = vmax.f32 (!%p1836_p4), %v1467_v13, 0.0  ;;  %v1469_v18 = vld [vmem:[#allocation7 + $0x48] sm:$0xff] (!%p1836_p4)  ;;  %v1470_v19 = vld [vmem:[#allocation7 + $0x50] sm:$0xff] (!%p1836_p4)  ;;  %v1484_v20 = vmax.f32 (!%p1836_p4), %v1468_v17, 0.0 }
 0x2ba   : > { %1534 = vst [vmem:[%s2693_s3 + $0x40] sm:$0xff] %v1452_v50  ;;  %1502 = vst [vmem:[%s2820_s30 + $0x48] sm:$0xff] %v1453_v54  ;;  %v1485_v21 = vmax.f32 %v1469_v18, 0.0  ;;  %v1486_v22 = vmax.f32 %v1470_v19, 0.0  ;;  %v1471_v23 = vld [vmem:[#allocation7 + $0x58] sm:$0xff] }
 0x2bb   : > { %1535 = vst [vmem:[%s2693_s3 + $0x48] sm:$0xff] %v1453_v54  ;;  %1503 = vst [vmem:[%s2820_s30 + $0x50] sm:$0xff] %v1454_v55  ;;  %v1487_v26 = vmax.f32 %v1471_v23, 0.0 }
 0x2bc   : > { %v1442_v59 = vld [vmem:[#allocation6 + $0x70] sm:$0xff]  ;;  %1536 = vst [vmem:[%s2693_s3 + $0x50] sm:$0xff] %v1454_v55  ;;  %1504 = vst [vmem:[%s2820_s30 + $0x58] sm:$0xff] %v1455_v56 }
 0x2bd   : > { %v1440_v57 = vld [vmem:[#allocation6 + $0x60] sm:$0xff]  ;;  %v1458_v62 = vmax.f32 %v1442_v59, 0.0  ;;  %1537 = vst [vmem:[%s2693_s3 + $0x58] sm:$0xff] %v1455_v56  ;;  %1510 = vst [vmem:[%s2855_s7] sm:$0xff] %v1476_v3  ;;  %v1474_v29 = vld [vmem:[#allocation7 + $0x70] sm:$0xff] }
 0x2be   : > { %v1456_v60 = vmax.f32 %v1440_v57, 0.0  ;;  %v1443_v63 = vld [vmem:[#allocation6 + $0x78] sm:$0xff]  ;;  %1542 = vst [vmem:[%s2697_s12] sm:$0xff] %v1476_v3  ;;  %1511 = vst [vmem:[%s2855_s7 + $0x8] sm:$0xff] %v1477_v4  ;;  %v1472_v24 = vld [vmem:[#allocation7 + $0x60] sm:$0xff]  ;;  %v1490_v31 = vmax.f32 %v1474_v29, 0.0 }
 0x2bf   : > { %v1441_v58 = vld [vmem:[#allocation6 + $0x68] sm:$0xff]  ;;  %v1459_v2 = vmax.f32 %v1443_v63, 0.0  ;;  %1507 = vst [vmem:[%s2820_s30 + $0x70] sm:$0xff] %v1458_v62  ;;  %1540 = vst [vmem:[%s2693_s3 + $0x70] sm:$0xff] %v1458_v62  ;;  %v1488_v27 = vmax.f32 %v1472_v24, 0.0  ;;  %v1475_v30 = vld [vmem:[#allocation7 + $0x78] sm:$0xff] }
 0x2c0   : > { %v1457_v61 = vmax.f32 %v1441_v58, 0.0  ;;  %1505 = vst [vmem:[%s2820_s30 + $0x60] sm:$0xff] %v1456_v60  ;;  %1538 = vst [vmem:[%s2693_s3 + $0x60] sm:$0xff] %v1456_v60  ;;  %v1473_v25 = vld [vmem:[#allocation7 + $0x68] sm:$0xff]  ;;  %v1491_v32 = vmax.f32 %v1475_v30, 0.0 }
 0x2c1   : > { %1508 = vst [vmem:[%s2820_s30 + $0x78] sm:$0xff] %v1459_v2  ;;  %1541 = vst [vmem:[%s2693_s3 + $0x78] sm:$0xff] %v1459_v2  ;;  %v1489_v28 = vmax.f32 %v1473_v25, 0.0 }
 0x2c2   : > { %1506 = vst [vmem:[%s2820_s30 + $0x68] sm:$0xff] %v1457_v61  ;;  %1539 = vst [vmem:[%s2693_s3 + $0x68] sm:$0xff] %v1457_v61 }
 0x2c3   : > { %1543 = vst [vmem:[%s2697_s12 + $0x8] sm:$0xff] %v1477_v4  ;;  %1512 = vst [vmem:[%s2855_s7 + $0x10] sm:$0xff] %v1478_v8 }
 0x2c4   : > { %1544 = vst [vmem:[%s2697_s12 + $0x10] sm:$0xff] %v1478_v8  ;;  %1513 = vst [vmem:[%s2855_s7 + $0x18] sm:$0xff] %v1479_v9 }
 0x2c5   : > { %1545 = vst [vmem:[%s2697_s12 + $0x18] sm:$0xff] %v1479_v9  ;;  %1514 = vst [vmem:[%s2855_s7 + $0x20] sm:$0xff] %v1480_v10 }
 0x2c6   : > { %1546 = vst [vmem:[%s2697_s12 + $0x20] sm:$0xff] %v1480_v10  ;;  %1515 = vst [vmem:[%s2855_s7 + $0x28] sm:$0xff] %v1481_v14 }
 0x2c7   : > { %1547 = vst [vmem:[%s2697_s12 + $0x28] sm:$0xff] %v1481_v14  ;;  %1516 = vst [vmem:[%s2855_s7 + $0x30] sm:$0xff] %v1482_v15 }
 0x2c8   : > { %1548 = vst [vmem:[%s2697_s12 + $0x30] sm:$0xff] %v1482_v15  ;;  %1517 = vst [vmem:[%s2855_s7 + $0x38] sm:$0xff] %v1483_v16 }
 0x2c9   : > { %1549 = vst [vmem:[%s2697_s12 + $0x38] sm:$0xff] %v1483_v16  ;;  %1518 = vst [vmem:[%s2855_s7 + $0x40] sm:$0xff] %v1484_v20 }
 0x2ca   : > { %1550 = vst [vmem:[%s2697_s12 + $0x40] sm:$0xff] %v1484_v20  ;;  %1519 = vst [vmem:[%s2855_s7 + $0x48] sm:$0xff] %v1485_v21 }
 0x2cb   : > { %1551 = vst [vmem:[%s2697_s12 + $0x48] sm:$0xff] %v1485_v21  ;;  %1520 = vst [vmem:[%s2855_s7 + $0x50] sm:$0xff] %v1486_v22 }
 0x2cc   : > { %1552 = vst [vmem:[%s2697_s12 + $0x50] sm:$0xff] %v1486_v22  ;;  %1521 = vst [vmem:[%s2855_s7 + $0x58] sm:$0xff] %v1487_v26 }
 0x2cd   : > { %1553 = vst [vmem:[%s2697_s12 + $0x58] sm:$0xff] %v1487_v26  ;;  %1522 = vst [vmem:[%s2855_s7 + $0x60] sm:$0xff] %v1488_v27 }
 0x2ce   : > { %1554 = vst [vmem:[%s2697_s12 + $0x60] sm:$0xff] %v1488_v27  ;;  %1523 = vst [vmem:[%s2855_s7 + $0x68] sm:$0xff] %v1489_v28 }
 0x2cf   : > { %1555 = vst [vmem:[%s2697_s12 + $0x68] sm:$0xff] %v1489_v28  ;;  %1524 = vst [vmem:[%s2855_s7 + $0x70] sm:$0xff] %v1490_v31 }
 0x2d0   : > { %1556 = vst [vmem:[%s2697_s12 + $0x70] sm:$0xff] %v1490_v31  ;;  %1525 = vst [vmem:[%s2855_s7 + $0x78] sm:$0xff] %v1491_v32 }
 0x2d1   : > { %1557 = vst [vmem:[%s2697_s12 + $0x78] sm:$0xff] %v1491_v32 }
 0x2d2 PF: > { %s1947_s22 = smul.u32 48, %s2341_s8  ;;  %s1579_s18 = sshll.u32 %s2693_s3, 4  ;;  %s2894_s18 = int_to_ptr.vmem [resolvable:$true] %s1579_s18 }
 0x2d3   : > { %s3071_s2 = sld [smem:[#allocation41_spill]]  ;;  %s1559_s1 = scalar_lea.sflag [#allocation12], %s2611_s0 }
 0x2d4   : > { %s2892_s11 = sadd.s32 %s2345_s9, %s1947_s22  ;;  %s2183_s20 = scalar_lea.vmem %s2894_s18, 2048 }
 0x2d5   : > { %s1841_s21 = sshll.u32 %s2892_s11, 7  ;;  %p2184_p9 = scmp.ne.s32.totalorder %s2894_s18, %s2183_s20 }
 0x2d6   : > { %p3072_p10 = scmp.ne.s32.totalorder %s3056_s17, 0  ;;  %s2370_s8 = smov [#allocation13]  }
 0x2d7   : > { %s2187_s9 = sshll.u32 %s2370_s8, 4  ;;  %s2188_s9 = int_to_ptr.vmem [resolvable:$false] %s2187_s9 }
 0x2d8   : > { %p2185_p13 = pnand %p2184_p9, %p3072_p10  ;;  %s2189_s3 = scalar_lea.vmem %s2188_s9, 4096 }
 0x2d9   : > { %s2902_s6 = scalar_lea.hbm %s3071_s2, %s1841_s21  ;;  %p2190_p11 = scmp.lt.s32.totalorder %s2894_s18, %s2188_s9 }
 0x2da   : > { %p2186_p8 = pneg %p2185_p13  ;;  %p2191_p12 = scmp.lt.s32.totalorder %s2189_s3, %s2183_s20 }
 0x2dc   : > { %p2192_p5 = por %p2191_p12, %p2190_p11 }
 0x2de   : > { %p2193_p7 = pnand %p2192_p5, %p2186_p8 }
 0x2e0   : > { %2196 = shalt.err (!%p2193_p7)
}
 0x2e1   : > { %s2197_s5 = scalar_lea.hbm %s2902_s6, 2048  ;;  %s2201_s16 = scalar_lea.hbm %s3071_s2, 18432 }
 0x2e2   : > { %p2198_p0 = scmp.ne.s32.totalorder %s2902_s6, %s2197_s5  ;;  %p2202_p6 = scmp.lt.u32.totalorder %s2902_s6, %s3071_s2 }
 0x2e3   : > { %p2203_p3 = scmp.lt.u32.totalorder %s2201_s16, %s2197_s5  ;;  %p2205_p9 = scmp.lt.u32.totalorder %s2197_s5, %s2902_s6 }
 0x2e4   : > { %p2199_p2 = pnand %p2198_p0, %p3072_p10 }
 0x2e5   : > { %p2204_p4 = por %p2203_p3, %p2202_p6 }
 0x2e6   : > { %p2200_p1 = pneg %p2199_p2 }
 0x2e7   : > { %p2206_p13 = por %p2205_p9, %p2204_p4 }
 0x2e9   : > { %p2207_p8 = pnand %p2206_p13, %p2200_p1 }
 0x2eb   : > { %2210 = shalt.err (!%p2207_p8)
}
 0x2ec   : > { %s2371_s7 = smov 128   ;;  %s2372_s22 = smov 384  }
 0x2ed   : > { %s2373_s29 = smov 8   ;;  %s3073_s8 = sld [smem:[#allocation42_spill]] }
 0x2ee   : > { %1956 = dma.vmem_to_hbm [thread:$0]  (%p3072_p10), %s2894_s18, 2048, %s2902_s6, %s1559_s1, %s2371_s7, %s2372_s22, %s2373_s29  }
 0x2ef   : > { %s1597_s5 = sshll.u32 %s2697_s12, 4  ;;  %s1564_s15 = scalar_lea.sflag [#allocation15], %s2611_s0  ;;  %s2939_s5 = int_to_ptr.vmem [resolvable:$true] %s1597_s5 }
 0x2f0   : > { %s2211_s19 = scalar_lea.vmem %s2939_s5, 2048  ;;  %s2374_s16 = smov [#allocation14]  }
 0x2f1   : > { %p2212_p11 = scmp.ne.s32.totalorder %s2939_s5, %s2211_s19  ;;  %s2215_s18 = sshll.u32 %s2374_s16, 4  ;;  %s2216_s18 = int_to_ptr.vmem [resolvable:$false] %s2215_s18 }
 0x2f2   : > { %s2217_s11 = scalar_lea.vmem %s2216_s18, 4096  ;;  %p2218_p7 = scmp.lt.s32.totalorder %s2939_s5, %s2216_s18 }
 0x2f3   : > { %s3074_s3 = smov %s3073_s8  ;;  %s2936_s9 = scalar_lea.hbm %s3073_s8, %s1841_s21 }
 0x2f4   : > { %p2213_p12 = pnand %p2212_p11, %p3072_p10  ;;  %p2219_p0 = scmp.lt.s32.totalorder %s2217_s11, %s2211_s19 }
 0x2f6   : > { %p2214_p5 = pneg %p2213_p12  ;;  %p2220_p2 = por %p2219_p0, %p2218_p7 }
 0x2f8   : > { %p2221_p1 = pnand %p2220_p2, %p2214_p5 }
 0x2fa   : > { %2224 = shalt.err (!%p2221_p1)
}
 0x2fb   : > { %s2225_s12 = scalar_lea.hbm %s2936_s9, 2048  ;;  %s2229_s1 = scalar_lea.hbm %s3074_s3, 18432 }
 0x2fc   : > { %p2226_p6 = scmp.ne.s32.totalorder %s2936_s9, %s2225_s12  ;;  %p2230_p9 = scmp.lt.u32.totalorder %s2936_s9, %s3074_s3 }
 0x2fd   : > { %p2231_p13 = scmp.lt.u32.totalorder %s2229_s1, %s2225_s12  ;;  %p2233_p11 = scmp.lt.u32.totalorder %s2225_s12, %s2936_s9 }
 0x2fe   : > { %p2227_p3 = pnand %p2226_p6, %p3072_p10 }
 0x2ff   : > { %p2232_p8 = por %p2231_p13, %p2230_p9 }
 0x300   : > { %p2228_p4 = pneg %p2227_p3 }
 0x301   : > { %p2234_p12 = por %p2233_p11, %p2232_p8 }
 0x303   : > { %p2235_p5 = pnand %p2234_p12, %p2228_p4 }
 0x305   : > { %2238 = shalt.err (!%p2235_p5)
}
 0x306   : > { %1957 = dma.vmem_to_hbm [thread:$0]  (%p3072_p10), %s2939_s5, 2048, %s2936_s9, %s1564_s15, %s2371_s7, %s2372_s22, %s2373_s29  }
 0x307 PF: > { %p1967_p7 = scmp.ge.s32.totalorder %s2361_s13, 2  ;;  %s1612_s10 = sand.u32 1, %s2313_s24  }
 0x308   : > { %p3075_p0 = scmp.ne.s32.totalorder %s3059_s27, 0  ;;  %s1613_s20 = scalar_lea.sflag [#allocation12], %s1612_s10 }
 0x30a   : > { %p1961_p2 = pnand %p1967_p7, %p3075_p0 }
 0x30c   : > { %2304 = dma.done.wait (!%p1961_p2), %s1613_s20, 2048  }
 0x30d   : > { %2306 = vsyncadd (!%p1961_p2), %s1613_s20, 4294965248  ;;  %s1622_s17 = scalar_lea.sflag [#allocation15], %s1612_s10 }
 0x30e   : > { %2308 = dma.done.wait (!%p1961_p2), %s1622_s17, 2048  }
 0x30f   : > { %2310 = vsyncadd (!%p1961_p2), %s1622_s17, 4294965248  ;;  %s27_s13 = sadd.s32 1, %s2361_s13   ;;  %s3077_s7 = sld [smem:[#allocation35_spill]] }
 0x310   : > { %p2973_p1 = scmp.ge.s32.totalorder %s27_s13, 29   ;;  %s3078_s22 = sld [smem:[#allocation27_spill]] }
 0x311   : > { %s3079_s29 = sld [smem:[#allocation34_spill]]  ;;  %s3080_s30 = sld [smem:[#allocation28_spill]] }
 0x312   : > { %s3081_s8 = sld [smem:[#allocation29_spill]]  ;;  %s3082_s9 = sld [smem:[#allocation30_spill]] }
 0x313   : > { %s3083_s10 = sld [smem:[#allocation31_spill]]  ;;  %s3084_s11 = sld [smem:[#allocation32_spill]] }
 0x314   : > { %s3085_s12 = sld [smem:[#allocation33_spill]]  ;;  %s3086_s24 = smov %s2317_s25 }
 0x315   : > { %s3087_s25 = smov %s2321_s26  ;;  %s3088_s26 = smov %s3077_s7 }
 0x316   : > { %s3089_s27 = smov %s2329_s28  ;;  %s3090_s28 = smov %s3078_s22 }
 0x317   :  { %26 = sbr.rel (!%p2973_p1) target bundleno = 20 (0x14), region = 185 }
 0x31e   :  { %1627 = vsyncpa [#allocation11], 1 }
 0x31f   :  { %1629 = vsyncpa [#allocation11 + $0x1], 1 }
 0x320   :  { %1630 = vsyncpa [#allocation12], 1 }
 0x321   :  { %1632 = vsyncpa [#allocation12 + $0x1], 1 }
 0x322   :  { %1633 = vsyncpa [#allocation15], 1 }
 0x323   :  { %1635 = vsyncpa [#allocation15 + $0x1], 1 }
 0x324   :  { %1636 = vsyncmov [#allocation8] }
 0x327   :  { %s1637_s5 = vpop.sfrf %1636 }
 0x328   :  { %p1847_p10 = scmp.ne.s32.totalorder %s1637_s5, 0 }
 0x32a   :  { %1641 = shalt.err (%p1847_p10)  }
 0x32b   :  { %1643 = vsyncmov [#allocation8 + $0x1] }
 0x32e   :  { %s1644_s15 = vpop.sfrf %1643 }
 0x32f   :  { %p1848_p6 = scmp.ne.s32.totalorder %s1644_s15, 0 }
 0x331   :  { %1648 = shalt.err (%p1848_p6)  }

</bundles_post_ra>
